<compile_context>
chip_gen: v7x
topology: tpu7x:2x2x1
jax: 0.10.0
libtpu: 0.0.40
codegen_flags: <defaults>
</compile_context>

<pallas_src>
import math
import numpy as np
import jax
import jax.numpy as jnp
from jax.experimental import pallas as pl
from jax.experimental.pallas import tpu as pltpu


# -----------------------------------------------------------------------------
# Clebsch-Gordan coefficients (numpy, computed once at init).
# -----------------------------------------------------------------------------
def _clebsch_gordan(l1, l2, l, m1, m2, m):
    if m1 + m2 != m or l < abs(l1 - l2) or l > l1 + l2:
        return 0.0
    if abs(m1) > l1 or abs(m2) > l2 or abs(m) > l:
        return 0.0
    f = math.factorial
    pref = math.sqrt((2 * l + 1) * f(l1 + l2 - l) * f(l1 - l2 + l) * f(-l1 + l2 + l)
                     / f(l1 + l2 + l + 1))
    pref *= math.sqrt(f(l + m) * f(l - m) * f(l1 - m1) * f(l1 + m1)
                      * f(l2 - m2) * f(l2 + m2))
    kmin = max(0, l2 - l - m1, l1 - l + m2)
    kmax = min(l1 + l2 - l, l1 - m1, l2 + m2)
    s = 0.0
    for k in range(kmin, kmax + 1):
        s += ((-1) ** k) / (f(k) * f(l1 + l2 - l - k) * f(l1 - m1 - k)
                            * f(l2 + m2 - k) * f(l - l2 + m1 + k) * f(l - l1 - m2 + k))
    return pref * s


def build_cg_tables(max_l):
    tables = {}
    for l1 in range(max_l + 1):
        for l2 in range(max_l + 1):
            for l in range(abs(l1 - l2), min(l1 + l2, max_l) + 1):
                t = np.zeros((2 * l + 1, 2 * l1 + 1, 2 * l2 + 1), np.float64)
                for mi, m in enumerate(range(-l, l + 1)):
                    for m1i, m1 in enumerate(range(-l1, l1 + 1)):
                        for m2i, m2 in enumerate(range(-l2, l2 + 1)):
                            t[mi, m1i, m2i] = _clebsch_gordan(l1, l2, l, m1, m2, m)
                tables[(l1, l2, l)] = t
    return tables


def cg_product_type(tau1, tau2, maxl):
    out = [0] * (maxl + 1)
    for l in range(maxl + 1):
        for l1 in range(len(tau1)):
            for l2 in range(len(tau2)):
                if abs(l1 - l2) <= l <= l1 + l2:
                    out[l] += int(tau1[l1]) * int(tau2[l2])
    return out


# -----------------------------------------------------------------------------
# Constant CG slabs (built once at init with numpy).
# -----------------------------------------------------------------------------
def _build_constants(N, C, L, cg_tables):
    # flat vertex offsets per l
    offs, o = [], 0
    for l in range(L + 1):
        offs.append(o)
        o += (2 * l + 1) * C
    Dv = o
    # flat spherical-harmonic offsets per l (no channel)
    soff, o = [], 0
    for l in range(L + 1):
        soff.append(o)
        o += 2 * l + 1
    S = o
    frag_lists = [[(l1, l2) for l1 in range(L + 1) for l2 in range(L + 1)
                   if abs(l1 - l2) <= l <= l1 + l2] for l in range(L + 1)]
    T = [len(frag_lists[l]) * C * C for l in range(L + 1)]      # fragment counts

    # K_NL: dense constant slab for the nonlinear (self) CG product.
    #   cg_nl[n, off_nl[l] + m*T[l] + k] = sum_{a,b} K_NL[a*Dv+b, col] mp[n,a] mp[n,b]
    P_nl = [(2 * l + 1) * T[l] for l in range(L + 1)]
    off_nl = list(np.cumsum([0] + P_nl[:-1]))
    P_nl_tot = int(sum(P_nl))
    K_NL = np.zeros((Dv * Dv, P_nl_tot), np.float32)
    for l in range(L + 1):
        k = 0
        for (l1, l2) in frag_lists[l]:
            cg = cg_tables[(l1, l2, l)]
            for t1 in range(C):
                for t2 in range(C):
                    for m in range(2 * l + 1):
                        for m1 in range(2 * l1 + 1):
                            for m2 in range(2 * l2 + 1):
                                coef = float(cg[m, m1, m2])
                                if coef == 0.0:
                                    continue
                                a = offs[l1] + m1 * C + t1
                                b = offs[l2] + m2 * C + t2
                                K_NL[a * Dv + b, off_nl[l] + m * T[l] + k] += coef
                    k += 1

    # KA[l]: constant slab folding the relative CG product (mixed x sph) so it
    # can be pre-contracted with (sph . w_rel) once per forward.
    KA = []
    for l in range(L + 1):
        ka = np.zeros((Dv, 2 * l + 1, S, T[l]), np.float32)
        s_idx = 0
        for (l1, l2) in frag_lists[l]:
            cg = cg_tables[(l1, l2, l)]
            for t1 in range(C):
                for t2 in range(C):
                    for m in range(2 * l + 1):
                        for m1 in range(2 * l1 + 1):
                            for m2 in range(2 * l2 + 1):
                                coef = float(cg[m, m1, m2])
                                if coef == 0.0:
                                    continue
                                a = offs[l1] + m1 * C + t1
                                b = soff[l2] + m2
                                ka[a, m, b, s_idx] += coef
                    s_idx += 1
        KA.append(ka)
    return offs, Dv, soff, S, T, off_nl, P_nl_tot, K_NL, KA


def _build_wnl_big(w_nl, N, C, L, T, off_nl, P_nl_tot, offs, Dv):
    """Block-diagonal per-atom w_nl so every l shares one batched contraction."""
    big = np.zeros((N, P_nl_tot, Dv), np.float32)
    for l in range(L + 1):
        wl = np.asarray(w_nl[l])                     # [N, T[l], C]
        for m in range(2 * l + 1):
            r0 = int(off_nl[l]) + m * T[l]
            c0 = offs[l] + m * C
            big[:, r0:r0 + T[l], c0:c0 + C] = wl
    return jnp.asarray(big)


# -----------------------------------------------------------------------------
# Pallas kernels.
# -----------------------------------------------------------------------------
def _make_sw_call(N, S, R):
    """Partner-atom contraction (the only O(N^2) reduction), done once:
       sw[n, b, r] = sum_j ylm_t[n, b, j] * wrel_cat[n, j, r]."""
    def kernel(ylm_ref, wrel_ref, out_ref):
        out_ref[...] = jnp.einsum('nmk,nkc->nmc', ylm_ref[...], wrel_ref[...],
                                  preferred_element_type=jnp.float32)

    vmem = pltpu.MemorySpace.VMEM
    return pl.pallas_call(
        kernel,
        out_shape=jax.ShapeDtypeStruct((N, S, R), jnp.float32),
        in_specs=[pl.BlockSpec(memory_space=vmem)] * 2,
        out_specs=pl.BlockSpec(memory_space=vmem),
        compiler_params=pltpu.CompilerParams(vmem_limit_bytes=32 * 1024 * 1024),
    )


def _make_layer_call(N, C, L, Dv, offs):
    """One fused Pallas kernel per CG layer."""
    G = (L + 1) * C * C
    OUT_W = ((Dv + G + 127) // 128) * 128            # lane-dense padded output

    def kernel(v_ref, conn_ref, knl_ref, wnl_ref, aop_ref, out_ref):
        v = v_ref[...]                               # [N, Dv]
        conn = conn_ref[...]                         # [N, N]

        # 1) message passing for all l at once: one MXU matmul.
        mp = jnp.dot(conn, v, preferred_element_type=jnp.float32)           # [N, Dv]

        # 2) nonlinear CG product of mp with itself as ONE constant-slab matmul.
        #    outer[n, a*Dv + b] = mp[n, a] * mp[n, b]
        outer = jnp.concatenate([mp[:, a:a + 1] * mp for a in range(Dv)], axis=1)
        cg_nl = jnp.dot(outer, knl_ref[...], preferred_element_type=jnp.float32)

        # 3) w_nl mixing, all l fused (block-diagonal) into one batched matvec.
        mixed = jnp.einsum('nmk,nkc->nmc', cg_nl[:, None, :], wnl_ref[...],
                           preferred_element_type=jnp.float32)[:, 0, :]      # [N, Dv]

        # 4) relative CG product with sph + w_rel mixing + partner-atom sum,
        #    pre-folded (layer-invariant) into the per-atom operator A.
        summed = jnp.einsum('nmk,nkc->nmc', mixed[:, None, :], aop_ref[...],
                            preferred_element_type=jnp.float32)[:, 0, :]     # [N, Dv]

        # 5) NormalizeVecArr (signed global sum per part, as in the reference)
        #    + GetSO3Norm rows, emitted as a single lane-dense store.
        v_pieces = []
        gram_pieces = []
        for l in range(L + 1):
            w = (2 * l + 1) * C
            part = summed[:, offs[l]:offs[l] + w]                            # [N, w]
            inv = pl.reciprocal(jnp.sum(part, keepdims=True), approx=True)   # [1, 1]
            normed = part * inv
            v_pieces.append(normed)
            p_ms = [normed[:, m * C:(m + 1) * C] for m in range(2 * l + 1)]  # [N, C]
            for c1 in range(C):
                g = p_ms[0][:, c1:c1 + 1] * p_ms[0]
                for m in range(1, 2 * l + 1):
                    g = g + p_ms[m][:, c1:c1 + 1] * p_ms[m]
                gram_pieces.append(g)                                        # [N, C]

        pieces = v_pieces + gram_pieces
        pad_w = OUT_W - (Dv + G)
        if pad_w > 0:
            pieces.append(jnp.zeros((N, pad_w), jnp.float32))
        out_ref[...] = jnp.concatenate(pieces, axis=1)                       # [N, OUT_W]

    vmem = pltpu.MemorySpace.VMEM
    call = pl.pallas_call(
        kernel,
        out_shape=jax.ShapeDtypeStruct((N, OUT_W), jnp.float32),
        in_specs=[pl.BlockSpec(memory_space=vmem)] * 5,
        out_specs=pl.BlockSpec(memory_space=vmem),
        compiler_params=pltpu.CompilerParams(vmem_limit_bytes=32 * 1024 * 1024),
    )
    return call, G, OUT_W


# -----------------------------------------------------------------------------
# Setup glue (ordinary XLA ops outside the kernels).
# -----------------------------------------------------------------------------
def make_ylm(rel_pos, max_l):
    """Real spherical harmonics (l <= 1), [N, N, S]; SphArr.forward equivalent.
    TODO(synk): GElib SO3part.spharm is complex; real harmonics used instead."""
    n = rel_pos.shape[0]
    x, y, z = rel_pos[..., 0], rel_pos[..., 1], rel_pos[..., 2]
    r = jnp.sqrt(x * x + y * y + z * z)
    rs = jnp.where(r > 0, r, 1.0)
    cols = [jnp.full((n, n, 1), 0.28209479177387814, jnp.float32)]
    if max_l >= 1:
        c1 = 0.4886025119029199
        cols.append(jnp.stack([c1 * y / rs, c1 * z / rs, c1 * x / rs], axis=-1))
    assert max_l <= 1, "real spherical harmonics implemented for l <= 1 only"
    return jnp.concatenate(cols, axis=-1).astype(jnp.float32)


class CGLayersPallas:
    def __init__(self, num_CG_layers, num_atoms, num_channels, max_l, hard_cut_rad, key):
        C = int(num_channels[0])
        L = int(max_l[0])
        N = int(num_atoms)
        self.N, self.C, self.L = N, C, L
        self.num_layers = int(num_CG_layers)
        self.hard_cut_rad = float(hard_cut_rad)

        cg_tables = build_cg_tables(L)
        (offs, Dv, soff, S, T, off_nl, P_nl_tot, K_NL_np, KA_np) = \
            _build_constants(N, C, L, cg_tables)
        self.Dv = Dv
        roff = [int(x) for x in np.cumsum([0] + [T[l] * C for l in range(L)])]
        R = sum(T[l] * C for l in range(L + 1))

        # SO3weightsArr.randn equivalents, shared by every CG layer as in the
        # reference (weights built once and reused by every layer).
        keys = jax.random.split(key, 2 * (L + 1))
        w_nl = [jax.random.normal(keys[l], (N, T[l], C), jnp.float32)
                for l in range(L + 1)]
        w_rel = [jax.random.normal(keys[L + 1 + l], (N, N, T[l], C), jnp.float32)
                 for l in range(L + 1)]

        wnl_big = _build_wnl_big(w_nl, N, C, L, T, off_nl, P_nl_tot, offs, Dv)
        wrel_cat = jnp.concatenate(
            [jnp.reshape(w_rel[l], (N, N, T[l] * C)) for l in range(L + 1)], axis=-1)
        K_NL = jnp.asarray(K_NL_np)
        KA = [jnp.asarray(k) for k in KA_np]

        layer_call, G, OUT_W = _make_layer_call(N, C, L, Dv, offs)
        sw_call = _make_sw_call(N, S, R)
        self.G = G

        num_layers = self.num_layers
        hard_cut = self.hard_cut_rad

        def forward(v_flat, rel_pos, norms):
            # ---- one-time, layer-invariant setup -----------------------------
            ylm = make_ylm(rel_pos, L)                          # [N, N, S]
            ylm_t = jnp.transpose(ylm, (0, 2, 1))               # [N, S, N]
            conn = (norms < hard_cut).astype(jnp.float32)       # [N, N]

            # Partner-atom contraction (only O(N^2) reduction) done ONCE:
            sw = sw_call(ylm_t, wrel_cat)                       # [N, S, R]

            # Fold constant relative-CG slab + w_rel into per-atom operator A.
            a_blocks = []
            for l in range(L + 1):
                sw_l = jnp.reshape(sw[:, :, roff[l]:roff[l] + T[l] * C],
                                   (N, S, T[l], C))
                a_l = jnp.einsum('ambs,nbsc->namc', KA[l], sw_l)
                a_blocks.append(jnp.reshape(a_l, (N, Dv, (2 * l + 1) * C)))
            a_op = jnp.concatenate(a_blocks, axis=2)            # [N, Dv, Dv]

            # ---- per-layer fused Pallas kernel --------------------------------
            scalars_all = []
            v = v_flat
            for _ in range(num_layers):
                out = layer_call(v, conn, K_NL, wnl_big, a_op)  # [N, OUT_W]
                v = out[:, :Dv]
                gram = out[:, Dv:Dv + G]
                # torch.reshape(parts[0], (C, N)) is a row-major reshape in the
                # reference (not a transpose) -- reproduced deliberately.
                part0 = jnp.reshape(v[:, :C], (C, N))
                scalars_all.append(
                    jnp.concatenate([part0, jnp.transpose(gram)], axis=0))
            return jnp.concatenate(scalars_all, axis=0)

        self._forward = jax.jit(forward)

    def __call__(self, vertices_parts, rel_pos, norms):
        N = self.N
        v_flat = jnp.concatenate(
            [jnp.reshape(vertices_parts[l], (N, (2 * l + 1) * self.C))
             for l in range(self.L + 1)], axis=-1)
        return self._forward(v_flat, rel_pos, norms)


if __name__ == "__main__":
    key = jax.random.PRNGKey(0)
    k_pos, k_v0, k_v1, k_w = jax.random.split(key, 4)
    N, C, L = 8, 2, 1
    num_layers = 2
    hard_cut_rad = 1.5

    model = CGLayersPallas(num_layers, N, [C], [L], hard_cut_rad, k_w)

    pos = jax.random.normal(k_pos, (N, 3), jnp.float32)
    rel_pos = pos[:, None, :] - pos[None, :, :]                 # [N, N, 3]
    norms = jnp.sqrt(jnp.sum(rel_pos ** 2, axis=-1))            # [N, N]
    vertices = [jax.random.normal(k_v0, (N, 1, C), jnp.float32),   # l = 0 part
                jax.random.normal(k_v1, (N, 3, C), jnp.float32)]   # l = 1 part

    out = model(vertices, rel_pos, norms)
    out = jax.block_until_ready(out)

    expected_rows = num_layers * (C + (L + 1) * C * C)
    assert out.shape == (expected_rows, N), out.shape
    assert bool(jnp.all(jnp.isfinite(out))), "non-finite output"
    print("KERNEL_OK")
</pallas_src>

<mosaic_0001>
module attributes {stable_mosaic.version = 11 : i64} {
  func.func @kernel(%arg0: memref<8x4x8xf32, #tpu.memory_space<vmem>>, %arg1: memref<8x8x40xf32, #tpu.memory_space<vmem>>, %arg2: memref<8x4x40xf32, #tpu.memory_space<vmem>>) attributes {dimension_semantics = [], scalar_prefetch = 0 : i64, scratch_operands = 0 : i64, tpu.core_type = #tpu.core_type<tc>} {
    %c0 = arith.constant 0 : index
    %c0_0 = arith.constant 0 : index
    %c0_1 = arith.constant 0 : index
    %0 = vector.load %arg0[%c0, %c0_0, %c0_1] : memref<8x4x8xf32, #tpu.memory_space<vmem>>, vector<8x4x8xf32>
    %c0_2 = arith.constant 0 : index
    %c0_3 = arith.constant 0 : index
    %c0_4 = arith.constant 0 : index
    %1 = vector.load %arg1[%c0_2, %c0_3, %c0_4] : memref<8x8x40xf32, #tpu.memory_space<vmem>>, vector<8x8x40xf32>
    "tpu.trace_start"() <{level = 10 : i32, message = "nmk,nkc->nmc"}> : () -> ()
    %cst = arith.constant dense<0.000000e+00> : vector<8x4x40xf32>
    %2 = tpu.matmul %0, %1, %cst {dimension_numbers = #tpu.dot_dimension_numbers<[2], [1], [1], [2], [0, 0, 0, 1, 1, 2], [0], [0]>} : vector<8x4x8xf32>, vector<8x8x40xf32>, vector<8x4x40xf32> -> vector<8x4x40xf32>
    "tpu.trace_stop"() : () -> ()
    %c0_5 = arith.constant 0 : index
    %c0_6 = arith.constant 0 : index
    %c0_7 = arith.constant 0 : index
    %3 = vector.load %arg2[%c0_5, %c0_6, %c0_7] : memref<8x4x40xf32, #tpu.memory_space<vmem>>, vector<8x4x40xf32>
    tpu.vector_store %arg2[%c0_5, %c0_6, %c0_7], %2 {strides = array<i32>} : memref<8x4x40xf32, #tpu.memory_space<vmem>>, vector<8x4x40xf32>,
    return
  }
}

module attributes {stable_mosaic.version = 11 : i64} {
  func.func @kernel(%arg0: memref<8x8xf32, #tpu.memory_space<vmem>>, %arg1: memref<8x8xf32, #tpu.memory_space<vmem>>, %arg2: memref<64x44xf32, #tpu.memory_space<vmem>>, %arg3: memref<8x44x8xf32, #tpu.memory_space<vmem>>, %arg4: memref<8x8x8xf32, #tpu.memory_space<vmem>>, %arg5: memref<8x128xf32, #tpu.memory_space<vmem>>) attributes {dimension_semantics = [], scalar_prefetch = 0 : i64, scratch_operands = 0 : i64, tpu.core_type = #tpu.core_type<tc>} {
    %c0 = arith.constant 0 : index
    %c0_0 = arith.constant 0 : index
    %0 = vector.load %arg0[%c0, %c0_0] : memref<8x8xf32, #tpu.memory_space<vmem>>, vector<8x8xf32>
    %c0_1 = arith.constant 0 : index
    %c0_2 = arith.constant 0 : index
    %1 = vector.load %arg1[%c0_1, %c0_2] : memref<8x8xf32, #tpu.memory_space<vmem>>, vector<8x8xf32>
    %cst = arith.constant dense<0.000000e+00> : vector<8x8xf32>
    %2 = tpu.matmul %1, %0, %cst {dimension_numbers = #tpu.dot_dimension_numbers<[1], [0], [0], [1], [0, 0, 1, 1], [], []>} : vector<8x8xf32>, vector<8x8xf32>, vector<8x8xf32> -> vector<8x8xf32>
    %3 = vector.extract_strided_slice %2 {offsets = [0, 0], sizes = [8, 1], strides = [1, 1]} : vector<8x8xf32> to vector<8x1xf32>
    %4 = vector.broadcast %3 : vector<8x1xf32> to vector<8x8xf32>
    %5 = arith.mulf %4, %2 : vector<8x8xf32>
    %6 = vector.extract_strided_slice %2 {offsets = [0, 1], sizes = [8, 1], strides = [1, 1]} : vector<8x8xf32> to vector<8x1xf32>
    %7 = vector.broadcast %6 : vector<8x1xf32> to vector<8x8xf32>
    %8 = arith.mulf %7, %2 : vector<8x8xf32>
    %9 = vector.extract_strided_slice %2 {offsets = [0, 2], sizes = [8, 1], strides = [1, 1]} : vector<8x8xf32> to vector<8x1xf32>
    %10 = vector.broadcast %9 : vector<8x1xf32> to vector<8x8xf32>
    %11 = arith.mulf %10, %2 : vector<8x8xf32>
    %12 = vector.extract_strided_slice %2 {offsets = [0, 3], sizes = [8, 1], strides = [1, 1]} : vector<8x8xf32> to vector<8x1xf32>
    %13 = vector.broadcast %12 : vector<8x1xf32> to vector<8x8xf32>
    %14 = arith.mulf %13, %2 : vector<8x8xf32>
    %15 = vector.extract_strided_slice %2 {offsets = [0, 4], sizes = [8, 1], strides = [1, 1]} : vector<8x8xf32> to vector<8x1xf32>
    %16 = vector.broadcast %15 : vector<8x1xf32> to vector<8x8xf32>
    %17 = arith.mulf %16, %2 : vector<8x8xf32>
    %18 = vector.extract_strided_slice %2 {offsets = [0, 5], sizes = [8, 1], strides = [1, 1]} : vector<8x8xf32> to vector<8x1xf32>
    %19 = vector.broadcast %18 : vector<8x1xf32> to vector<8x8xf32>
    %20 = arith.mulf %19, %2 : vector<8x8xf32>
    %21 = vector.extract_strided_slice %2 {offsets = [0, 6], sizes = [8, 1], strides = [1, 1]} : vector<8x8xf32> to vector<8x1xf32>
    %22 = vector.broadcast %21 : vector<8x1xf32> to vector<8x8xf32>
    %23 = arith.mulf %22, %2 : vector<8x8xf32>
    %24 = vector.extract_strided_slice %2 {offsets = [0, 7], sizes = [8, 1], strides = [1, 1]} : vector<8x8xf32> to vector<8x1xf32>
    %25 = vector.broadcast %24 : vector<8x1xf32> to vector<8x8xf32>
    %26 = arith.mulf %25, %2 : vector<8x8xf32>
    %27 = tpu.concatenate %5, %8, %11, %14, %17, %20, %23, %26 in 1 : vector<8x8xf32>, vector<8x8xf32>, vector<8x8xf32>, vector<8x8xf32>, vector<8x8xf32>, vector<8x8xf32>, vector<8x8xf32>, vector<8x8xf32> -> vector<8x64xf32>
    %c0_3 = arith.constant 0 : index
    %c0_4 = arith.constant 0 : index
    %28 = vector.load %arg2[%c0_3, %c0_4] : memref<64x44xf32, #tpu.memory_space<vmem>>, vector<64x44xf32>
    %cst_5 = arith.constant dense<0.000000e+00> : vector<8x44xf32>
    %29 = tpu.matmul %27, %28, %cst_5 {dimension_numbers = #tpu.dot_dimension_numbers<[1], [0], [0], [1], [0, 0, 1, 1], [], []>} : vector<8x64xf32>, vector<64x44xf32>, vector<8x44xf32> -> vector<8x44xf32>
    %30 = vector.shape_cast %29 : vector<8x44xf32> to vector<8x1x44xf32>
    %c0_6 = arith.constant 0 : index
    %c0_7 = arith.constant 0 : index
    %c0_8 = arith.constant 0 : index
    %31 = vector.load %arg3[%c0_6, %c0_7, %c0_8] : memref<8x44x8xf32, #tpu.memory_space<vmem>>, vector<8x44x8xf32>
    "tpu.trace_start"() <{level = 10 : i32, message = "nmk,nkc->nmc"}> : () -> ()
    %cst_9 = arith.constant dense<0.000000e+00> : vector<8x1x8xf32>
    %32 = tpu.matmul %30, %31, %cst_9 {dimension_numbers = #tpu.dot_dimension_numbers<[2], [1], [1], [2], [0, 0, 0, 1, 1, 2], [0], [0]>} : vector<8x1x44xf32>, vector<8x44x8xf32>, vector<8x1x8xf32> -> vector<8x1x8xf32>
    "tpu.trace_stop"() : () -> ()
    %33 = vector.shape_cast %32 : vector<8x1x8xf32> to vector<8x8xf32>
    %34 = vector.shape_cast %33 : vector<8x8xf32> to vector<8x1x8xf32>
    %c0_10 = arith.constant 0 : index
    %c0_11 = arith.constant 0 : index
    %c0_12 = arith.constant 0 : index
    %35 = vector.load %arg4[%c0_10, %c0_11, %c0_12] : memref<8x8x8xf32, #tpu.memory_space<vmem>>, vector<8x8x8xf32>
    "tpu.trace_start"() <{level = 10 : i32, message = "nmk,nkc->nmc"}> : () -> ()
    %cst_13 = arith.constant dense<0.000000e+00> : vector<8x1x8xf32>
    %36 = tpu.matmul %34, %35, %cst_13 {dimension_numbers = #tpu.dot_dimension_numbers<[2], [1], [1], [2], [0, 0, 0, 1, 1, 2], [0], [0]>} : vector<8x1x8xf32>, vector<8x8x8xf32>, vector<8x1x8xf32> -> vector<8x1x8xf32>
    "tpu.trace_stop"() : () -> ()
    %37 = vector.shape_cast %36 : vector<8x1x8xf32> to vector<8x8xf32>
    %38 = vector.extract_strided_slice %37 {offsets = [0, 0], sizes = [8, 2], strides = [1, 1]} : vector<8x8xf32> to vector<8x2xf32>
    %39 = vector.shape_cast %38 : vector<8x2xf32> to vector<1x8x2xf32>
    %cst_14 = arith.constant dense<0.000000e+00> : vector<1xf32>
    %40 = vector.multi_reduction <add>, %39, %cst_14 [1, 2] : vector<1x8x2xf32> to vector<1xf32>
    %41 = vector.shape_cast %40 : vector<1xf32> to vector<1x1x1xf32>
    %42 = vector.extract %41[0, 0, 0] : f32 from vector<1x1x1xf32>
    %43 = vector.broadcast %42 : f32 to vector<1x1xf32>
    %44 = tpu.reciprocal %43 {approx = true} : vector<1x1xf32> -> vector<1x1xf32>
    %45 = vector.broadcast %44 : vector<1x1xf32> to vector<8x2xf32>
    %46 = arith.mulf %38, %45 : vector<8x2xf32>
    %47 = vector.extract_strided_slice %46 {offsets = [0, 0], sizes = [8, 1], strides = [1, 1]} : vector<8x2xf32> to vector<8x1xf32>
    %48 = vector.broadcast %47 : vector<8x1xf32> to vector<8x2xf32>
    %49 = arith.mulf %48, %46 : vector<8x2xf32>
    %50 = vector.extract_strided_slice %46 {offsets = [0, 1], sizes = [8, 1], strides = [1, 1]} : vector<8x2xf32> to vector<8x1xf32>
    %51 = vector.broadcast %50 : vector<8x1xf32> to vector<8x2xf32>
    %52 = arith.mulf %51, %46 : vector<8x2xf32>
    %53 = vector.extract_strided_slice %37 {offsets = [0, 2], sizes = [8, 6], strides = [1, 1]} : vector<8x8xf32> to vector<8x6xf32>
    %54 = vector.shape_cast %53 : vector<8x6xf32> to vector<1x8x6xf32>
    %cst_15 = arith.constant dense<0.000000e+00> : vector<1xf32>
    %55 = vector.multi_reduction <add>, %54, %cst_15 [1, 2] : vector<1x8x6xf32> to vector<1xf32>
    %56 = vector.shape_cast %55 : vector<1xf32> to vector<1x1x1xf32>
    %57 = vector.extract %56[0, 0, 0] : f32 from vector<1x1x1xf32>
    %58 = vector.broadcast %57 : f32 to vector<1x1xf32>
    %59 = tpu.reciprocal %58 {approx = true} : vector<1x1xf32> -> vector<1x1xf32>
    %60 = vector.broadcast %59 : vector<1x1xf32> to vector<8x6xf32>
    %61 = arith.mulf %53, %60 : vector<8x6xf32>
    %62 = vector.extract_strided_slice %61 {offsets = [0, 0], sizes = [8, 2], strides = [1, 1]} : vector<8x6xf32> to vector<8x2xf32>
    %63 = vector.extract_strided_slice %61 {offsets = [0, 2], sizes = [8, 2], strides = [1, 1]} : vector<8x6xf32> to vector<8x2xf32>
    %64 = vector.extract_strided_slice %61 {offsets = [0, 4], sizes = [8, 2], strides = [1, 1]} : vector<8x6xf32> to vector<8x2xf32>
    %65 = vector.extract_strided_slice %62 {offsets = [0, 0], sizes = [8, 1], strides = [1, 1]} : vector<8x2xf32> to vector<8x1xf32>
    %66 = vector.broadcast %65 : vector<8x1xf32> to vector<8x2xf32>
    %67 = arith.mulf %66, %62 : vector<8x2xf32>
    %68 = vector.extract_strided_slice %63 {offsets = [0, 0], sizes = [8, 1], strides = [1, 1]} : vector<8x2xf32> to vector<8x1xf32>
    %69 = vector.broadcast %68 : vector<8x1xf32> to vector<8x2xf32>
    %70 = arith.mulf %69, %63 : vector<8x2xf32>
    %71 = arith.addf %67, %70 : vector<8x2xf32>
    %72 = vector.extract_strided_slice %64 {offsets = [0, 0], sizes = [8, 1], strides = [1, 1]} : vector<8x2xf32> to vector<8x1xf32>
    %73 = vector.broadcast %72 : vector<8x1xf32> to vector<8x2xf32>
    %74 = arith.mulf %73, %64 : vector<8x2xf32>
    %75 = arith.addf %71, %74 : vector<8x2xf32>
    %76 = vector.extract_strided_slice %62 {offsets = [0, 1], sizes = [8, 1], strides = [1, 1]} : vector<8x2xf32> to vector<8x1xf32>
    %77 = vector.broadcast %76 : vector<8x1xf32> to vector<8x2xf32>
    %78 = arith.mulf %77, %62 : vector<8x2xf32>
    %79 = vector.extract_strided_slice %63 {offsets = [0, 1], sizes = [8, 1], strides = [1, 1]} : vector<8x2xf32> to vector<8x1xf32>
    %80 = vector.broadcast %79 : vector<8x1xf32> to vector<8x2xf32>
    %81 = arith.mulf %80, %63 : vector<8x2xf32>
    %82 = arith.addf %78, %81 : vector<8x2xf32>
    %83 = vector.extract_strided_slice %64 {offsets = [0, 1], sizes = [8, 1], strides = [1, 1]} : vector<8x2xf32> to vector<8x1xf32>
    %84 = vector.broadcast %83 : vector<8x1xf32> to vector<8x2xf32>
    %85 = arith.mulf %84, %64 : vector<8x2xf32>
    %86 = arith.addf %82, %85 : vector<8x2xf32>
    %cst_16 = arith.constant 0.000000e+00 : f32
    %87 = vector.broadcast %cst_16 : f32 to vector<8x112xf32>
    %88 = tpu.concatenate %46, %61, %49, %52, %75, %86, %87 in 1 : vector<8x2xf32>, vector<8x6xf32>, vector<8x2xf32>, vector<8x2xf32>, vector<8x2xf32>, vector<8x2xf32>, vector<8x112xf32> -> vector<8x128xf32>
    %c0_17 = arith.constant 0 : index
    %c0_18 = arith.constant 0 : index
    %89 = vector.load %arg5[%c0_17, %c0_18] : memref<8x128xf32, #tpu.memory_space<vmem>>, vector<8x128xf32>
    tpu.vector_store %arg5[%c0_17, %c0_18], %88 {strides = array<i32>} : memref<8x128xf32, #tpu.memory_space<vmem>>, vector<8x128xf32>,
    return
  }
}

</mosaic_0001>

<bundles_post_ra>
// kernel: forward.3
= control target key start
LH: loop header
LB: loop body
LE: loop exit
PB: predicated region body
PF: predicated region fallthrough
CT: control target
= control target key end

     0   :  { %v691_v0 = vmov 0.0   ;;  %vm27_vm0 = vcmask 64512   ;;  %vm692_vm1 = vmmov 0   ;;  %vm612_vm2 = vcmask 322560   ;;  %s804_s1 = inlined_call_operand.vmem [shape: f32[8,8,40], index: 1, kind: input, shape index: {}]   ;;  %s805_s0 = inlined_call_operand.vmem [shape: f32[8,4,8], index: 0, kind: input, shape index: {}]   ;;  %s806_s2 = inlined_call_operand.vmem [shape: f32[8,4,40], index: 2, kind: output, shape index: {}]  }
   0x1   :  { %649 = vmatprep.subr.mxu0 %v691_v0  ;;  %654 = vmatprep.subr.mxu1 %v691_v0  ;;  %v19_v1 = vld [vmem:[%s804_s1] sm:$0xff]  ;;  %v20_v2 = vld [vmem:[%s804_s1 + $0x8] sm:$0xff]  ;;  %v21_v5 = vld [vmem:[%s804_s1 + $0x10] sm:$0xff] }
   0x2   :  { %v11_v3 = vld [vmem:[%s805_s0] sm:$0xf]  ;;  %650 = vmatpush3.msra.mxu0 %v19_v1  ;;  %651 = vmatprep.mubr.msk.f32.mxu0 %vm692_vm1, %v691_v0  ;;  %v12_v4 = vld [vmem:[%s805_s0 + $0x4] sm:$0xf]  ;;  %v22_v6 = vld [vmem:[%s804_s1 + $0x18] sm:$0xff] }
   0x3   :  { %655 = vmatpush3.msra.mxu1 %v20_v2  ;;  %656 = vmatprep.mubr.msk.f32.mxu1 %vm692_vm1, %v691_v0  ;;  %v13_v7 = vld [vmem:[%s805_s0 + $0x8] sm:$0xf]  ;;  %v14_v8 = vld [vmem:[%s805_s0 + $0xc] sm:$0xf]  ;;  %v23_v9 = vld [vmem:[%s804_s1 + $0x20] sm:$0xff] }
   0x4   :  { %652 = vmatmul.mubr.msk.f32.vlgmr.msra.gmra.mrb[0].mxu0 %vm27_vm0, %v11_v3  ;;  %657 = vmatmul.mubr.msk.f32.vlgmr.msra.gmra.mrb[0].mxu1 %vm27_vm0, %v12_v4  ;;  %v24_v10 = vld [vmem:[%s804_s1 + $0x28] sm:$0xff]  ;;  %v15_v11 = vld [vmem:[%s805_s0 + $0x10] sm:$0xf]  ;;  %v16_v12 = vld [vmem:[%s805_s0 + $0x14] sm:$0xf] }
   0x5   :  { %659 = vmatprep.subr.mxu0 %v691_v0  ;;  %664 = vmatprep.subr.mxu1 %v691_v0  ;;  %v25_v13 = vld [vmem:[%s804_s1 + $0x30] sm:$0xff]  ;;  %v26_v14 = vld [vmem:[%s804_s1 + $0x38] sm:$0xff] }
   0x6   :  { %660 = vmatpush3.msra.mxu0 %v21_v5  ;;  %665 = vmatpush3.msra.mxu1 %v22_v6  ;;  %v17_v15 = vld [vmem:[%s805_s0 + $0x18] sm:$0xf]  ;;  %v18_v16 = vld [vmem:[%s805_s0 + $0x1c] sm:$0xf] }
   0x7   :  { %661 = vmatprep.mubr.msk.f32.mxu0 %vm692_vm1, %v691_v0  ;;  %666 = vmatprep.mubr.msk.f32.mxu1 %vm692_vm1, %v691_v0 }
   0x8   :  { %662 = vmatmul.mubr.msk.f32.vlgmr.msra.gmra.mrb[2].mxu0 %vm27_vm0, %v13_v7  ;;  %667 = vmatmul.mubr.msk.f32.vlgmr.msra.gmra.mrb[2].mxu1 %vm27_vm0, %v14_v8 }
   0x9   :  { %669 = vmatprep.subr.mxu0 %v691_v0  ;;  %674 = vmatprep.subr.mxu1 %v691_v0 }
   0xa   :  { %670 = vmatpush3.msra.mxu0 %v23_v9  ;;  %675 = vmatpush3.msra.mxu1 %v24_v10 }
   0xb   :  { %671 = vmatprep.mubr.msk.f32.mxu0 %vm692_vm1, %v691_v0  ;;  %676 = vmatprep.mubr.msk.f32.mxu1 %vm692_vm1, %v691_v0 }
   0xc   :  { %672 = vmatmul.mubr.msk.f32.vlgmr.msra.gmra.mrb[4].mxu0 %vm27_vm0, %v15_v11  ;;  %677 = vmatmul.mubr.msk.f32.vlgmr.msra.gmra.mrb[4].mxu1 %vm27_vm0, %v16_v12 }
   0xd   :  { %679 = vmatprep.subr.mxu0 %v691_v0  ;;  %684 = vmatprep.subr.mxu1 %v691_v0 }
   0xe   :  { %680 = vmatpush3.msra.mxu0 %v25_v13  ;;  %685 = vmatpush3.msra.mxu1 %v26_v14 }
   0xf   :  { %681 = vmatprep.mubr.msk.f32.mxu0 %vm692_vm1, %v691_v0  ;;  %686 = vmatprep.mubr.msk.f32.mxu1 %vm692_vm1, %v691_v0 }
  0x10   :  { %682 = vmatmul.mubr.msk.f32.vlgmr.msra.gmra.mrb[6].mxu0 %vm27_vm0, %v17_v15  ;;  %687 = vmatmul.mubr.msk.f32.vlgmr.msra.gmra.mrb[6].mxu1 %vm27_vm0, %v18_v16 }
  0xd7   :  { %v97_v17 = vpop.f32.mrb[0].mxu0  ;;  %v170_v18 = vpop.f32.mrb[0].mxu1 }
  0xd8   :  { %613 = vst.msk [vmem:[%s806_s2] sm:$0xf] %vm612_vm2, %v97_v17  ;;  %614 = vst.msk [vmem:[%s806_s2 + $0x4] sm:$0xf] %vm612_vm2, %v170_v18  ;;  %v653_v19 = vpop.f32.mrb[1].mxu0  ;;  %v658_v20 = vpop.f32.mrb[1].mxu1 }
  0xdb   :  { %v243_v21 = vpop.f32.mrb[2].mxu0  ;;  %v316_v22 = vpop.f32.mrb[2].mxu1 }
  0xdc   :  { %615 = vst.msk [vmem:[%s806_s2 + $0x8] sm:$0xf] %vm612_vm2, %v243_v21  ;;  %616 = vst.msk [vmem:[%s806_s2 + $0xc] sm:$0xf] %vm612_vm2, %v316_v22  ;;  %v663_v23 = vpop.f32.mrb[3].mxu0  ;;  %v668_v24 = vpop.f32.mrb[3].mxu1 }
  0xdf   :  { %v389_v25 = vpop.f32.mrb[4].mxu0  ;;  %v462_v26 = vpop.f32.mrb[4].mxu1 }
  0xe0   :  { %617 = vst.msk [vmem:[%s806_s2 + $0x10] sm:$0xf] %vm612_vm2, %v389_v25  ;;  %618 = vst.msk [vmem:[%s806_s2 + $0x14] sm:$0xf] %vm612_vm2, %v462_v26  ;;  %v673_v27 = vpop.f32.mrb[5].mxu0  ;;  %v678_v28 = vpop.f32.mrb[5].mxu1 }
  0xe3   :  { %v535_v29 = vpop.f32.mrb[6].mxu0  ;;  %v608_v30 = vpop.f32.mrb[6].mxu1 }
  0xe4   :  { %619 = vst.msk [vmem:[%s806_s2 + $0x18] sm:$0xf] %vm612_vm2, %v535_v29  ;;  %620 = vst.msk [vmem:[%s806_s2 + $0x1c] sm:$0xf] %vm612_vm2, %v608_v30  ;;  %v683_v31 = vpop.f32.mrb[7].mxu0  ;;  %v688_v32 = vpop.f32.mrb[7].mxu1 }

// kernel: forward.4
= control target key start
LH: loop header
LB: loop body
LE: loop exit
PB: predicated region body
PF: predicated region fallthrough
CT: control target
= control target key end

     0   :  { %vm22_vm0 = vcmask 64512   ;;  %v2721_v0 = vmov 0.0   ;;  %vm2722_vm1 = vmmov 0   ;;  %v2723_v3 = vmov 3   ;;  %s2732_s11 = smov 8   ;;  %s2733_s12 = smov 24   ;;  %s3529_s0 = inlined_call_operand.vmem [shape: f32[8,8], index: 0, kind: input, shape index: {}]   ;;  %s3530_s1 = inlined_call_operand.vmem [shape: f32[8,8], index: 1, kind: input, shape index: {}]   ;;  %s3531_s2 = inlined_call_operand.vmem [shape: f32[64,44], index: 2, kind: input, shape index: {}]   ;;  %s3532_s3 = inlined_call_operand.vmem [shape: f32[8,44,8], index: 3, kind: input, shape index: {}]   ;;  %s3533_s4 = inlined_call_operand.vmem [shape: f32[8,8,8], index: 4, kind: input, shape index: {}]   ;;  %s3534_s5 = inlined_call_operand.vmem [shape: f32[8,128], index: 5, kind: output, shape index: {}]  }
   0x1   :  { %2376 = vmatprep.subr.mxu0 %v2721_v0  ;;  %v20_v1 = vld [vmem:[%s3529_s0] sm:$0xff]  ;;  %2378 = vmatprep.mubr.msk.f32.mxu0 %vm2722_vm1, %v2721_v0  ;;  %v2724_v4 = vmov 1   ;;  %v2725_v7 = vmov 4   ;;  %v2726_v8 = vmov 2   ;;  %v2727_v9 = vmov 5   ;;  %v179_v14 = vld [vmem:[%s3531_s2 + $0x8] sm:$0xff] }
   0x2   :  { %v21_v2 = vld [vmem:[%s3530_s1] sm:$0xff]  ;;  %2377 = vmatpush3.msra.mxu0 %v20_v1  ;;  %2682 = vset.pattern.permute.xlu1 %v2723_v3  ;;  %v2728_v10 = vmov 6   ;;  %v2729_v11 = vmov 7   ;;  %v2730_v12 = vmov 0   ;;  %v2731_v16 = vmov 0.0|0.0   ;;  %v180_v17 = vld [vmem:[%s3531_s2 + $0x10] sm:$0xff] }
   0x3   :  { %2379 = vmatmul.mubr.msk.f32.vlgmr.msra.gmra.mrb[0].mxu0 %vm22_vm0, %v21_v2  ;;  %2680 = vset.pattern.permute.xlu0 %v2724_v4  ;;  %v178_v13 = vld [vmem:[%s3531_s2] sm:$0xff]  ;;  %v181_v18 = vld [vmem:[%s3531_s2 + $0x18] sm:$0xff]  ;;  %v183_v21 = vld [vmem:[%s3531_s2 + $0x28] sm:$0xff]  ;;  %s2734_s16 = smov 16   ;;  %s2735_s21 = smov 32   ;;  %vm166_vm2 = vcmask 130048  }
   0x4   :  { %2397 = vmatprep.mubr.msk.f32.mxu1 %vm2722_vm1, %v2721_v0  ;;  %2412 = vmatprep.mubr.msk.f32.mxu0 %vm2722_vm1, %v2721_v0  ;;  %v2561_v15 = vpack.c.bf16 %v179_v14, %v178_v13  ;;  %v2564_v19 = vpack.c.bf16 %v181_v18, %v180_v17  ;;  %v182_v20 = vld [vmem:[%s3531_s2 + $0x20] sm:$0xff]  ;;  %v184_v25 = vld [vmem:[%s3531_s2 + $0x30] sm:$0xff]  ;;  %v185_v26 = vld [vmem:[%s3531_s2 + $0x38] sm:$0xff]  ;;  %s2736_s0 = smov 40   ;;  %s2737_s1 = smov 48   ;;  %vm168_vm3 = vcmask 195584  }
   0x5   :  { %2560 = vmatprep.subr.bf16.mxu1 %v2731_v16  ;;  %2572 = vmatprep.subr.bf16.mxu0 %v2731_v16  ;;  %v2567_v22 = vpack.c.bf16 %v183_v21, %v182_v20  ;;  %v2570_v28 = vpack.c.bf16 %v185_v26, %v184_v25  ;;  %v310_v33 = vld [vmem:[%s3532_s3] sm:$0xff]  ;;  %v311_v34 = vld [vmem:[%s3532_s3 + $0x8] sm:$0xff]  ;;  %v312_v36 = vld [vmem:[%s3532_s3 + $0x10] sm:$0xff]  ;;  %s2738_s22 = smov 56   ;;  %vm170_vm4 = vcmask 261120   ;;  %vm172_vm5 = vcmask 326656  }
   0x6   :  { %2562 = vmatpush3.bf16.msra.mxu1 %v2561_v15  ;;  %v2573_v35 = vpack.c.bf16 %v311_v34, %v310_v33  ;;  %v313_v37 = vld [vmem:[%s3532_s3 + $0x18] sm:$0xff]  ;;  %vm174_vm6 = vcmask 392192   ;;  %v322_v57 = vld [vmem:[%s3532_s3 + $0x60] sm:$0xff]  ;;  %v323_v58 = vld [vmem:[%s3532_s3 + $0x68] sm:$0xff]  ;;  %vm176_vm7 = vcmask 457728   ;;  %vm186_vm8 = vcmask 523264  }
   0x7   :  { %2563 = vmatprep.subr.bf16.mxu1 %v2731_v16  ;;  %v2576_v40 = vpack.c.bf16 %v313_v37, %v312_v36  ;;  %v2593_v62 = vpack.c.bf16 %v323_v58, %v322_v57  ;;  %v324_v1 = vld [vmem:[%s3532_s3 + $0x70] sm:$0xff]  ;;  %v325_v2 = vld [vmem:[%s3532_s3 + $0x78] sm:$0xff]  ;;  %v315_v13 = vld [vmem:[%s3532_s3 + $0x28] sm:$0xf]  ;;  %vm361_vm9 = vcmask 1043456   ;;  %vm2739_vm10 = vmmov 1  }
   0x8   :  { %2574 = vmatpush3.bf16.msra.mxu0 %v2573_v35  ;;  %vm2883_vm11 = vmpackc.low %vm361_vm9, %vm2739_vm10  ;;  %v326_v17 = vld [vmem:[%s3532_s3 + $0x80] sm:$0xff]  ;;  %v327_v18 = vld [vmem:[%s3532_s3 + $0x88] sm:$0xf]  ;;  %v2740_v20 = vmov 1966171168   ;;  %vm358_vm12 = vcmask 359424  }
   0x9   :  { %2575 = vmatprep.subr.bf16.mxu0 %v2731_v16  ;;  %v263_v21 = vunpack.c.l.s4 %v2740_v20  ;;  %v316_v26 = vld [vmem:[%s3532_s3 + $0x30] sm:$0xff]  ;;  %v318_v35 = vld [vmem:[%s3532_s3 + $0x40] sm:$0xff]  ;;  %v319_v36 = vld [vmem:[%s3532_s3 + $0x48] sm:$0xff]  ;;  %vm1561_vm13 = vcmask 1041409   ;;  %vm1564_vm14 = vcmask 1042434   ;;  %vm1567_vm15 = vcmask 1043459  }
   0xa   :  { %2565 = vmatpush3.bf16.msra.mxu1 %v2564_v19  ;;  %v2599_v19 = vpack.c.bf16 %v327_v18, %v326_v17  ;;  %v330_v58 = vld [vmem:[%s3532_s3 + $0xa0] sm:$0xff]  ;;  %v340_v17 = vld [vmem:[%s3532_s3 + $0xf0] sm:$0xff]  ;;  %v341_v18 = vld [vmem:[%s3532_s3 + $0xf8] sm:$0xff]  ;;  %vm2257_vm9 = vcmask 97280   ;;  %vm2259_vm10 = vcmask 113664  }
   0xb   :  { %2566 = vmatprep.subr.bf16.mxu1 %v2731_v16  ;;  %v2623_v20 = vpack.c.bf16 %v341_v18, %v340_v17  ;;  %v961_v15 = vld [vmem:[%s3533_s4 + $0x8] sm:$0xff] }
   0xc   :  { %2577 = vmatpush3.bf16.msra.mxu0 %v2576_v40  ;;  %v337_v40 = vld [vmem:[%s3532_s3 + $0xd8] sm:$0xff] }
   0xd   :  { %2578 = vmatprep.subr.bf16.mxu0 %v2731_v16 }
   0xe   :  { %2568 = vmatpush3.bf16.msra.mxu1 %v2567_v22  ;;  %v265_v22 = vlaneseq }
   0xf   :  { %2569 = vmatprep.subr.bf16.mxu1 %v2731_v16 }
  0x12   :  { %2571 = vmatpush3.bf16.msra.mxu1 %v2570_v28 }
  0x13   :  { %2592 = vmatprep.subr.bf16.mxu1 %v2731_v16 }
  0xd6   :  { %v2791_v5 = vpop.f32.mrb[0].mxu0 }
  0xd7   :  { %113 = vperm.xlu1 %2682, %v2791_v5   ;;  %103 = vperm.xlu0 %2680, %v2791_v5   ;;  %v2380_v6 = vpop.f32.mrb[1].mxu0 }
  0xd8   :  { %v2596_v6 = vpack.c.bf16 %v325_v2, %v324_v1  ;;  %v332_v2 = vld [vmem:[%s3532_s3 + $0xb0] sm:$0xff] }
  0xdb   :  { %2683 = vset.pattern.permute.xlu1 %v2725_v7  ;;  %2681 = vset.pattern.permute.xlu0 %v2726_v8 }
  0xdc   :  { %118 = vperm.xlu1 %2683, %v2791_v5   ;;  %108 = vperm.xlu0 %2681, %v2791_v5  }
  0xe0   :  { %2684 = vset.pattern.permute.xlu1 %v2727_v9  ;;  %2685 = vset.pattern.permute.xlu0 %v2728_v10 }
  0xe1   :  { %123 = vperm.xlu1 %2684, %v2791_v5   ;;  %128 = vperm.xlu0 %2685, %v2791_v5  }
  0xe5   :  { %2686 = vset.pattern.permute.xlu1 %v2729_v11  ;;  %2688 = vset.pattern.permute.xlu0 %v2730_v12 }
  0xe6   :  { %133 = vperm.xlu1 %2686, %v2791_v5  }
  0xea   :  { %2687 = vset.pattern.permute.xlu1 %v2730_v12  ;;  %v314_v12 = vld [vmem:[%s3532_s3 + $0x20] sm:$0xff] }
  0xeb   :  { %98 = vperm.xlu1 %2687, %v2791_v5   ;;  %v2579_v14 = vpack.c.bf16 %v315_v13, %v314_v12  ;;  %v350_v12 = vld [vmem:[%s3532_s3 + $0x140] sm:$0xff]  ;;  %v351_v13 = vld [vmem:[%s3532_s3 + $0x148] sm:$0xf] }
  0xed   :  { %2581 = vmatpush3.bf16.msk.msra.mxu0 %vm2883_vm11, %v2579_v14 }
  0xee   :  { %2582 = vmatprep.subr.bf16.mxu0 %v2731_v16 }
 0x156   :  { %v114_v23 = vpop.permute.xlu1 %113  ;;  %v104_v24 = vpop.permute.xlu0 %103 }
 0x157   :  { %v106_v27 = vmul.f32 %v104_v24, %v2791_v5  ;;  %v116_v29 = vmul.f32 %v114_v23, %v2791_v5  ;;  %v264_v23 = vunpack.c.0.s8 %v263_v21  ;;  %v266_v24 = vshrl.u32 %v265_v22, 7  ;;  %v342_v22 = vld [vmem:[%s3532_s3 + $0x100] sm:$0xff] }
 0x159   :  { %138 = vrot.lane.b32.xlu0 %v106_v27, %s2732_s11  ;;  %v2899_v25 = vsub.s32 %v264_v23, %v266_v24  ;;  %v317_v27 = vld [vmem:[%s3532_s3 + $0x38] sm:$0xff]  ;;  %v343_v23 = vld [vmem:[%s3532_s3 + $0x108] sm:$0xff] }
 0x15a   :  { %v2583_v33 = vpack.c.bf16 %v317_v27, %v316_v26  ;;  %v2626_v26 = vpack.c.bf16 %v343_v23, %v342_v22  ;;  %v344_v27 = vld [vmem:[%s3532_s3 + $0x110] sm:$0xff] }
 0x15b   :  { %v119_v30 = vpop.permute.xlu1 %118  ;;  %v109_v31 = vpop.permute.xlu0 %108 }
 0x15c   :  { %v111_v32 = vmul.f32 %v109_v31, %v2791_v5  ;;  %v121_v38 = vmul.f32 %v119_v30, %v2791_v5  ;;  %v334_v31 = vld [vmem:[%s3532_s3 + $0xc0] sm:$0xff] }
 0x15d   :  { %146 = vrot.lane.b32.xlu0 %v116_v29, %s2733_s12 }
 0x15e   :  { %142 = vrot.lane.b32.xlu1 %v111_v32, %s2734_s16  ;;  %v335_v32 = vld [vmem:[%s3532_s3 + $0xc8] sm:$0xff] }
 0x15f   :  { %v2613_v37 = vpack.c.bf16 %v335_v32, %v334_v31  ;;  %v352_v31 = vld [vmem:[%s3532_s3 + $0x150] sm:$0xff]  ;;  %v353_v32 = vld [vmem:[%s3532_s3 + $0x158] sm:$0xff] }
 0x160   :  { %v124_v39 = vpop.permute.xlu1 %123  ;;  %v129_v42 = vpop.permute.xlu0 %128 }
 0x161   :  { %v126_v41 = vmul.f32 %v124_v39, %v2791_v5  ;;  %v131_v43 = vmul.f32 %v129_v42, %v2791_v5  ;;  %v336_v39 = vld [vmem:[%s3532_s3 + $0xd0] sm:$0xff] }
 0x162   :  { %150 = vrot.lane.b32.xlu1 %v121_v38, %s2735_s21  ;;  %v320_v42 = vld [vmem:[%s3532_s3 + $0x50] sm:$0xff] }
 0x163   :  { %154 = vrot.lane.b32.xlu0 %v126_v41, %s2736_s0  ;;  %v2586_v41 = vpack.c.bf16 %v319_v36, %v318_v35  ;;  %v354_v35 = vld [vmem:[%s3532_s3 + $0x160] sm:$0xff]  ;;  %v355_v36 = vld [vmem:[%s3532_s3 + $0x168] sm:$0xff]  ;;  %s2742_s0 = smov 124  }
 0x165   :  { %v134_v44 = vpop.permute.xlu1 %133 }
 0x166   :  { %v136_v45 = vmul.f32 %v134_v44, %v2791_v5  ;;  %158 = vrot.lane.b32.xlu1 %v131_v43, %s2737_s1  ;;  %v321_v43 = vld [vmem:[%s3532_s3 + $0x58] sm:$0xf]  ;;  %v2616_v44 = vpack.c.bf16 %v337_v40, %v336_v39  ;;  %s2743_s1 = smov 10  }
 0x168   :  { %162 = vrot.lane.b32.xlu0 %v136_v45, %s2738_s22 }
 0x16a   :  { %v99_v46 = vpop.permute.xlu1 %98 }
 0x16b   :  { %v101_v48 = vmul.f32 %v99_v46, %v2791_v5  ;;  %v338_v46 = vld [vmem:[%s3532_s3 + $0xe0] sm:$0xff] }
 0x1cb   :  { %v139_v47 = vpop.permute.xlu0 %138 }
 0x1cc   :  { %v165_v49 = vsel %vm22_vm0, %v101_v48, %v139_v47  ;;  %v339_v47 = vld [vmem:[%s3532_s3 + $0xe8] sm:$0xf]  ;;  %v2589_v48 = vpack.c.bf16 %v321_v43, %v320_v42 }
 0x1cf   :  { %v147_v51 = vpop.permute.xlu0 %146 }
 0x1d0   :  { %v143_v50 = vpop.permute.xlu1 %142 }
 0x1d1   :  { %v167_v52 = vsel %vm166_vm2, %v165_v49, %v143_v50  ;;  %v328_v50 = vld [vmem:[%s3532_s3 + $0x90] sm:$0xff] }
 0x1d2   :  { %v169_v54 = vsel %vm168_vm3, %v167_v52, %v147_v51  ;;  %v329_v51 = vld [vmem:[%s3532_s3 + $0x98] sm:$0xff]  ;;  %v2619_v52 = vpack.c.bf16 %v339_v47, %v338_v46  ;;  %v962_v46 = vld [vmem:[%s3533_s4 + $0x10] sm:$0xff]  ;;  %vm1573_vm3 = vcmask 1045509  }
 0x1d4   :  { %v151_v53 = vpop.permute.xlu1 %150 }
 0x1d5   :  { %v171_v55 = vsel %vm170_vm4, %v169_v54, %v151_v53  ;;  %v155_v56 = vpop.permute.xlu0 %154  ;;  %v346_v54 = vld [vmem:[%s3532_s3 + $0x120] sm:$0xff]  ;;  %vm1576_vm4 = vcmask 1046534  }
 0x1d6   :  { %v173_v59 = vsel %vm172_vm5, %v171_v55, %v155_v56  ;;  %v347_v55 = vld [vmem:[%s3532_s3 + $0x128] sm:$0xff]  ;;  %v2603_v56 = vpack.c.bf16 %v329_v51, %v328_v50  ;;  %v964_v51 = vld [vmem:[%s3533_s4 + $0x20] sm:$0xff]  ;;  %vm1579_vm5 = vcmask 1047559  }
 0x1d8   :  { %v159_v60 = vpop.permute.xlu1 %158 }
 0x1d9   :  { %v175_v61 = vsel %vm174_vm6, %v173_v59, %v159_v60  ;;  %v331_v59 = vld [vmem:[%s3532_s3 + $0xa8] sm:$0xff]  ;;  %v2633_v60 = vpack.c.bf16 %v347_v55, %v346_v54  ;;  %vm1582_vm6 = vcmask 15360  }
 0x1da   :  { %v163_v63 = vpop.permute.xlu0 %162  ;;  %v2606_v1 = vpack.c.bf16 %v331_v59, %v330_v58  ;;  %v967_v58 = vld [vmem:[%s3533_s4 + $0x38] sm:$0xff] }
 0x1db   :  { %v177_v5 = vsel %vm176_vm7, %v175_v61, %v163_v63  ;;  %v349_v63 = vld [vmem:[%s3532_s3 + $0x138] sm:$0xff]  ;;  %vm1694_vm7 = vcmask 48128  }
 0x1dc   :  { %2398 = vmatmul.mubr.msk.f32.vlgmr.msra.gmra.mrb[0].mxu1 %vm186_vm8, %v177_v5  ;;  %v333_v5 = vld [vmem:[%s3532_s3 + $0xb8] sm:$0xf]  ;;  %vm2255_vm8 = vcmask 80896  }
 0x1dd   :  { %2594 = vmatpush3.bf16.msra.mxu1 %v2593_v62  ;;  %2442 = vmatprep.mubr.msk.f32.mxu1 %vm2722_vm1, %v2721_v0  ;;  %v348_v62 = vld [vmem:[%s3532_s3 + $0x130] sm:$0xff]  ;;  %v2609_v14 = vpack.c.bf16 %v333_v5, %v332_v2 }
 0x1de   :  { %2595 = vmatprep.subr.bf16.mxu1 %v2731_v16 }
 0x1e1   :  { %2597 = vmatpush3.bf16.msra.mxu1 %v2596_v6  ;;  %v2636_v6 = vpack.c.bf16 %v349_v63, %v348_v62 }
 0x1e2   :  { %2598 = vmatprep.subr.bf16.mxu1 %v2731_v16 }
 0x1e5   :  { %2601 = vmatpush3.bf16.msk.msra.mxu1 %vm2883_vm11, %v2599_v19  ;;  %v2639_v19 = vpack.c.bf16 %v351_v13, %v350_v12 }
 0x1e6   :  { %2612 = vmatprep.subr.bf16.mxu1 %v2731_v16 }
 0x2af   :  { %v256_v28 = vpop.f32.mrb[0].mxu1 }
 0x2b0   :  { %v268_v29 = vrot.slane %v256_v28, %v2899_v25  ;;  %v2399_v30 = vpop.f32.mrb[1].mxu1  ;;  %v261_v45 = vcombine.high %v256_v28, %v256_v28  ;;  %v345_v28 = vld [vmem:[%s3532_s3 + $0x118] sm:$0xf] }
 0x2b2   :  { %v284_v34 = vrot.slane %v268_v29, %v2899_v25  ;;  %v276_v49 = vcombine.high %v268_v29, %v268_v29  ;;  %v2955_v53 = vrot.slane %v261_v45, %v2899_v25  ;;  %v2629_v29 = vpack.c.bf16 %v345_v28, %v344_v27 }
 0x2b4   :  { %v306_v38 = vcombine.high %v284_v34, %v284_v34  ;;  %2413 = vmatmul.mubr.msk.f32.vlgmr.msra.gmra.mrb[2].mxu0 %vm358_vm12, %v284_v34  ;;  %v298_v57 = vrot.slane %v276_v49, %v2899_v25  ;;  %v291_v61 = vrot.slane %v2955_v53, %v2899_v25  ;;  %v277_v30 = vcombine.high %v2955_v53, %v2955_v53  ;;  %v965_v53 = vld [vmem:[%s3533_s4 + $0x28] sm:$0xff] }
 0x2b5   :  { %2584 = vmatpush3.bf16.msra.mxu0 %v2583_v33  ;;  %2427 = vmatprep.mubr.msk.f32.mxu0 %vm2722_vm1, %v2721_v0  ;;  %v2643_v33 = vpack.c.bf16 %v353_v32, %v352_v31 }
 0x2b6   :  { %2443 = vmatmul.mubr.msk.f32.vlgmr.msra.gmra.mrb[2].mxu1 %vm358_vm12, %v306_v38  ;;  %2585 = vmatprep.subr.bf16.mxu0 %v2731_v16  ;;  %v308_v21 = vcombine.high %v298_v57, %v298_v57  ;;  %v307_v24 = vcombine.high %v291_v61, %v291_v61  ;;  %v305_v34 = vrot.slane %v277_v30, %v2899_v25  ;;  %v356_v25 = vld [vmem:[%s3532_s3 + $0x170] sm:$0xff]  ;;  %v357_v38 = vld [vmem:[%s3532_s3 + $0x178] sm:$0xf] }
 0x2b7   :  { %2614 = vmatpush3.bf16.msra.mxu1 %v2613_v37  ;;  %2472 = vmatprep.mubr.msk.f32.mxu1 %vm2722_vm1, %v2721_v0  ;;  %v2646_v37 = vpack.c.bf16 %v355_v36, %v354_v35  ;;  %v2649_v39 = vpack.c.bf16 %v357_v38, %v356_v25 }
 0x2b8   :  { %2615 = vmatprep.subr.bf16.mxu1 %v2731_v16  ;;  %v309_v40 = vcombine.high %v305_v34, %v305_v34 }
 0x2b9   :  { %2587 = vmatpush3.bf16.msra.mxu0 %v2586_v41  ;;  %v960_v41 = vld [vmem:[%s3533_s4] sm:$0xff] }
 0x2ba   :  { %2588 = vmatprep.subr.bf16.mxu0 %v2731_v16 }
 0x2bb   :  { %2617 = vmatpush3.bf16.msra.mxu1 %v2616_v44 }
 0x2bc   :  { %2618 = vmatprep.subr.bf16.mxu1 %v2731_v16 }
 0x2bd   :  { %2591 = vmatpush3.bf16.msk.msra.mxu0 %vm2883_vm11, %v2589_v48 }
 0x2be   :  { %2602 = vmatprep.subr.bf16.mxu0 %v2731_v16 }
 0x2bf   :  { %2621 = vmatpush3.bf16.msk.msra.mxu1 %vm2883_vm11, %v2619_v52  ;;  %v966_v52 = vld [vmem:[%s3533_s4 + $0x30] sm:$0xff] }
 0x2c0   :  { %2428 = vmatmul.mubr.msk.f32.vlgmr.msra.gmra.mrb[4].mxu0 %vm358_vm12, %v298_v57  ;;  %2632 = vmatprep.subr.bf16.mxu1 %v2731_v16 }
 0x2c1   :  { %2604 = vmatpush3.bf16.msra.mxu0 %v2603_v56  ;;  %2457 = vmatprep.mubr.msk.f32.mxu0 %vm2722_vm1, %v2721_v0 }
 0x2c2   :  { %2473 = vmatmul.mubr.msk.f32.vlgmr.msra.gmra.mrb[4].mxu1 %vm358_vm12, %v291_v61  ;;  %2605 = vmatprep.subr.bf16.mxu0 %v2731_v16 }
 0x2c3   :  { %2634 = vmatpush3.bf16.msra.mxu1 %v2633_v60  ;;  %2502 = vmatprep.mubr.msk.f32.mxu1 %vm2722_vm1, %v2721_v0 }
 0x2c4   :  { %2635 = vmatprep.subr.bf16.mxu1 %v2731_v16 }
 0x2c5   :  { %2607 = vmatpush3.bf16.msra.mxu0 %v2606_v1 }
 0x2c6   :  { %2608 = vmatprep.subr.bf16.mxu0 %v2731_v16 }
 0x2c7   :  { %2637 = vmatpush3.bf16.msra.mxu1 %v2636_v6 }
 0x2c8   :  { %2638 = vmatprep.subr.bf16.mxu1 %v2731_v16 }
 0x2c9   :  { %2611 = vmatpush3.bf16.msk.msra.mxu0 %vm2883_vm11, %v2609_v14 }
 0x2ca   :  { %2622 = vmatprep.subr.bf16.mxu0 %v2731_v16 }
 0x2cb   :  { %2641 = vmatpush3.bf16.msk.msra.mxu1 %vm2883_vm11, %v2639_v19 }
 0x2cc   :  { %2458 = vmatmul.mubr.msk.f32.vlgmr.msra.gmra.mrb[6].mxu0 %vm358_vm12, %v308_v21  ;;  %2520 = vmatprep.subr.mxu1 %v2721_v0 }
 0x2cd   :  { %2624 = vmatpush3.bf16.msra.mxu0 %v2623_v20  ;;  %2487 = vmatprep.mubr.msk.f32.mxu0 %vm2722_vm1, %v2721_v0 }
 0x2ce   :  { %2503 = vmatmul.mubr.msk.f32.vlgmr.msra.gmra.mrb[6].mxu1 %vm358_vm12, %v307_v24  ;;  %2625 = vmatprep.subr.bf16.mxu0 %v2731_v16 }
 0x2cf   :  { %2522 = vmatprep.mubr.msk.f32.mxu1 %vm2722_vm1, %v2721_v0  ;;  %2521 = vmatpush3.msra.mxu1 %v960_v41 }
 0x2d0   :  { %2525 = vmatprep.subr.mxu1 %v2721_v0 }
 0x2d1   :  { %2627 = vmatpush3.bf16.msra.mxu0 %v2626_v26 }
 0x2d2   :  { %2628 = vmatprep.subr.bf16.mxu0 %v2731_v16 }
 0x2d5   :  { %2631 = vmatpush3.bf16.msk.msra.mxu0 %vm2883_vm11, %v2629_v29 }
 0x2d6   :  { %2642 = vmatprep.subr.bf16.mxu0 %v2731_v16 }
 0x2d8   :  { %2488 = vmatmul.mubr.msk.f32.vlgmr.msra.gmra.mrb[8].mxu0 %vm358_vm12, %v305_v34 }
 0x2d9   :  { %2644 = vmatpush3.bf16.msra.mxu0 %v2643_v33  ;;  %2517 = vmatprep.mubr.msk.f32.mxu0 %vm2722_vm1, %v2721_v0 }
 0x2da   :  { %2645 = vmatprep.subr.bf16.mxu0 %v2731_v16 }
 0x2dd   :  { %2647 = vmatpush3.bf16.msra.mxu0 %v2646_v37 }
 0x2de   :  { %2648 = vmatprep.subr.bf16.mxu0 %v2731_v16  ;;  %v963_v16 = vld [vmem:[%s3533_s4 + $0x18] sm:$0xff]  ;;  %s2741_s4 = smov 126  }
 0x2e1   :  { %2651 = vmatpush3.bf16.msk.msra.mxu0 %vm2883_vm11, %v2649_v39 }
 0x2e2   :  { %2535 = vmatprep.subr.mxu0 %v2721_v0 }
 0x2e4   :  { %2518 = vmatmul.mubr.msk.f32.vlgmr.msra.gmra.mrb[10].mxu0 %vm358_vm12, %v309_v40 }
 0x2e5   :  { %2537 = vmatprep.mubr.msk.f32.mxu0 %vm2722_vm1, %v2721_v0  ;;  %2536 = vmatpush3.msra.mxu0 %v963_v16 }
 0x2e6   :  { %2545 = vmatprep.subr.mxu0 %v2721_v0 }
 0x387   :  { %v431_v42 = vpop.f32.mrb[2].mxu0 }
 0x388   :  { %v2414_v43 = vpop.f32.mrb[3].mxu0  ;;  %2523 = vmatmul.mubr.msk.f32.vlgmr.msra.gmra.mrb[8].mxu1 %vm22_vm0, %v431_v42 }
 0x389   :  { %v581_v44 = vpop.f32.mrb[2].mxu1  ;;  %2526 = vmatpush3.msra.mxu1 %v961_v15  ;;  %2527 = vmatprep.mubr.msk.f32.mxu1 %vm2722_vm1, %v2721_v0 }
 0x38a   :  { %v2444_v45 = vpop.f32.mrb[3].mxu1  ;;  %2530 = vmatprep.subr.mxu1 %v2721_v0 }
 0x393   :  { %v506_v47 = vpop.f32.mrb[4].mxu0 }
 0x394   :  { %v2429_v48 = vpop.f32.mrb[5].mxu0  ;;  %2528 = vmatmul.mubr.msk.f32.vlgmr.msra.gmra.mrb[10].mxu1 %vm22_vm0, %v506_v47 }
 0x395   :  { %v731_v49 = vpop.f32.mrb[4].mxu1  ;;  %2531 = vmatpush3.msra.mxu1 %v962_v46  ;;  %2532 = vmatprep.mubr.msk.f32.mxu1 %vm2722_vm1, %v2721_v0 }
 0x396   :  { %v2474_v50 = vpop.f32.mrb[5].mxu1  ;;  %2540 = vmatprep.subr.mxu1 %v2721_v0 }
 0x398   :  { %2533 = vmatmul.mubr.msk.f32.vlgmr.msra.gmra.mrb[12].mxu1 %vm22_vm0, %v581_v44 }
 0x399   :  { %2541 = vmatpush3.msra.mxu1 %v964_v51  ;;  %2542 = vmatprep.mubr.msk.f32.mxu1 %vm2722_vm1, %v2721_v0 }
 0x39a   :  { %2550 = vmatprep.subr.mxu1 %v2721_v0 }
 0x39c   :  { %2543 = vmatmul.mubr.msk.f32.vlgmr.msra.gmra.mrb[14].mxu1 %vm22_vm0, %v731_v49 }
 0x39d   :  { %2551 = vmatpush3.msra.mxu1 %v966_v52  ;;  %2552 = vmatprep.mubr.msk.f32.mxu1 %vm2722_vm1, %v2721_v0 }
 0x39f   :  { %v656_v54 = vpop.f32.mrb[6].mxu0 }
 0x3a0   :  { %v2459_v55 = vpop.f32.mrb[7].mxu0  ;;  %2538 = vmatmul.mubr.msk.f32.vlgmr.msra.gmra.mrb[12].mxu0 %vm22_vm0, %v656_v54 }
 0x3a1   :  { %v881_v56 = vpop.f32.mrb[6].mxu1  ;;  %2546 = vmatpush3.msra.mxu0 %v965_v53  ;;  %2547 = vmatprep.mubr.msk.f32.mxu0 %vm2722_vm1, %v2721_v0 }
 0x3a2   :  { %v2504_v57 = vpop.f32.mrb[7].mxu1  ;;  %2553 = vmatmul.mubr.msk.f32.vlgmr.msra.gmra.mrb[16].mxu1 %vm22_vm0, %v881_v56  ;;  %2555 = vmatprep.subr.mxu0 %v2721_v0 }
 0x3ab   :  { %v806_v59 = vpop.f32.mrb[8].mxu0 }
 0x3ac   :  { %v2489_v60 = vpop.f32.mrb[9].mxu0  ;;  %2548 = vmatmul.mubr.msk.f32.vlgmr.msra.gmra.mrb[14].mxu0 %vm22_vm0, %v806_v59 }
 0x3ad   :  { %2556 = vmatpush3.msra.mxu0 %v967_v58  ;;  %2557 = vmatprep.mubr.msk.f32.mxu0 %vm2722_vm1, %v2721_v0  ;;  %vm1570_vm1 = vcmask 1044484  }
 0x3b7   :  { %v956_v61 = vpop.f32.mrb[10].mxu0 }
 0x3b8   :  { %v2519_v62 = vpop.f32.mrb[11].mxu0  ;;  %2558 = vmatmul.mubr.msk.f32.vlgmr.msra.gmra.mrb[16].mxu0 %vm22_vm0, %v956_v61 }
 0x45b   :  { %v3124_v63 = vpop.f32.mrb[8].mxu1 }
 0x45c   :  { %v2524_v1 = vpop.f32.mrb[9].mxu1 }
 0x467   :  { %v3126_v2 = vpop.f32.mrb[10].mxu1 }
 0x468   :  { %v1560_v5 = vrot.slane %v3126_v2, 7  ;;  %v2529_v6 = vpop.f32.mrb[11].mxu1 }
 0x46a   :  { %v1562_v12 = vsel %vm1561_vm13, %v1560_v5, %v3124_v63 }
 0x46b   :  { %v3131_v13 = vpop.f32.mrb[12].mxu1 }
 0x46c   :  { %v1563_v0 = vrot.slane %v3131_v13, 6  ;;  %v2534_v14 = vpop.f32.mrb[13].mxu1 }
 0x46e   :  { %v1565_v17 = vsel %vm1564_vm14, %v1563_v0, %v1562_v12 }
 0x46f   :  { %v3135_v18 = vpop.f32.mrb[14].mxu1 }
 0x470   :  { %v2544_v19 = vpop.f32.mrb[15].mxu1  ;;  %v1569_v23 = vrot.slane %v3135_v18, 4 }
 0x473   :  { %v3137_v20 = vpop.f32.mrb[12].mxu0 }
 0x474   :  { %v1566_v21 = vrot.slane %v3137_v20, 5  ;;  %v2539_v22 = vpop.f32.mrb[13].mxu0 }
 0x475   :  { %v3141_v24 = vpop.f32.mrb[16].mxu1 }
 0x476   :  { %v1568_v26 = vsel %vm1567_vm15, %v1566_v21, %v1565_v17  ;;  %v2554_v27 = vpop.f32.mrb[17].mxu1  ;;  %v1575_v32 = vrot.slane %v3141_v24, 2 }
 0x477   :  { %v1571_v28 = vsel %vm1570_vm1, %v1569_v23, %v1568_v26 }
 0x47f   :  { %v3145_v29 = vpop.f32.mrb[14].mxu0 }
 0x480   :  { %v1572_v30 = vrot.slane %v3145_v29, 3  ;;  %v2549_v31 = vpop.f32.mrb[15].mxu0 }
 0x482   :  { %v1574_v33 = vsel %vm1573_vm3, %v1572_v30, %v1571_v28 }
 0x483   :  { %v1577_v34 = vsel %vm1576_vm4, %v1575_v32, %v1574_v33 }
 0x48b   :  { %v3151_v35 = vpop.f32.mrb[16].mxu0 }
 0x48c   :  { %v1578_v36 = vrot.slane %v3151_v35, 1  ;;  %v2559_v37 = vpop.f32.mrb[17].mxu0 }
 0x48e   :  { %v1580_v25 = vsel %vm1579_vm5, %v1578_v36, %v1577_v34 }
 0x48f   :  { %1691 = vrot.lane.b32.xlu1 %v1580_v25, %s2741_s4  ;;  %v1583_v38 = vsel %vm1582_vm6, %v1580_v25, 0.0 }
 0x490   :  { %1584 = vadd.xlane.f32.xlu0 %v1583_v38 }
 0x501   :  { %v1692_v39 = vpop.permute.xlu1 %1691 }
 0x502   :  { %v1695_v40 = vsel %vm1694_vm7, %v1692_v39, 0.0 }
 0x503   :  { %1696 = vadd.xlane.f32.xlu1 %v1695_v40 }
 0x51d   :  { %v1585_v41 = vpop.xlane.xlu0 %1584 }
 0x51e   :  { %v1586_v16 = vrot.slane %v1585_v41, 4 }
 0x520   :  { %v1587_v15 = vadd.f32 %v1586_v16, %v1585_v41 }
 0x522   :  { %v1588_v42 = vrot.slane %v1587_v15, 2 }
 0x524   :  { %v1589_v43 = vadd.f32 %v1588_v42, %v1587_v15 }
 0x526   :  { %v1590_v44 = vrot.slane %v1589_v43, 1 }
 0x528   :  { %v1591_v45 = vadd.f32 %v1590_v44, %v1589_v43 }
 0x52a   :  { %2652 = vpush %v1591_v45 }
 0x55b   :  { %s2653_s20 = spop %2652 }
 0x55c   :  { %v1593_v46 = vstv %s2653_s20 }
 0x55d   :  { %2717 = vrcp.f32 %v1593_v46 }
 0x567   :  { %v2718_v47 = vpop.eup %2717 }
 0x568   :  { %v3158_v48 = vmul.f32 %v2718_v47, %v3135_v18  ;;  %v3161_v49 = vmul.f32 %v2718_v47, %v3124_v63  ;;  %v3166_v50 = vmul.f32 %v2718_v47, %v3126_v2  ;;  %v3172_v51 = vmul.f32 %v2718_v47, %v3131_v13 }
 0x569   :  { %v3175_v52 = vmul.f32 %v2718_v47, %v3137_v20  ;;  %v3180_v53 = vmul.f32 %v2718_v47, %v3145_v29  ;;  %v3185_v54 = vmul.f32 %v2718_v47, %v3151_v35  ;;  %v3190_v55 = vmul.f32 %v2718_v47, %v3141_v24 }
 0x56a   :  { %1625 = vperm.xlu0 %2688, %v3158_v48   ;;  %1605 = vperm.xlu1 %2687, %v3161_v49  }
 0x56e   :  { %2689 = vset.pattern.permute.xlu0 %v2724_v4  ;;  %1610 = vperm.xlu1 %2687, %v3166_v50  }
 0x56f   :  { %1652 = vperm.xlu0 %2689, %v3161_v49  }
 0x572   :  { %1615 = vperm.xlu1 %2687, %v3172_v51  }
 0x573   :  { %1664 = vperm.xlu0 %2689, %v3175_v52  }
 0x576   :  { %1620 = vperm.xlu1 %2687, %v3175_v52  }
 0x577   :  { %1672 = vperm.xlu0 %2689, %v3180_v53  }
 0x57a   :  { %1630 = vperm.xlu1 %2687, %v3180_v53  }
 0x57b   :  { %1680 = vperm.xlu0 %2689, %v3185_v54  }
 0x57e   :  { %1635 = vperm.xlu1 %2687, %v3190_v55  }
 0x57f   :  { %2692 = vset.pattern.permute.xlu0 %v2726_v8 }
 0x582   :  { %1640 = vperm.xlu1 %2687, %v3185_v54  }
 0x586   :  { %2690 = vset.pattern.permute.xlu1 %v2724_v4 }
 0x587   :  { %1656 = vperm.xlu1 %2690, %v3166_v50  }
 0x58b   :  { %1660 = vperm.xlu1 %2690, %v3172_v51  }
 0x58f   :  { %1668 = vperm.xlu1 %2690, %v3158_v48  }
 0x590   :  { %v1697_v56 = vpop.xlane.xlu1 %1696 }
 0x591   :  { %v1698_v57 = vrot.slane %v1697_v56, 4 }
 0x593   :  { %v1699_v58 = vadd.f32 %v1698_v57, %v1697_v56  ;;  %1676 = vperm.xlu1 %2690, %v3190_v55  }
 0x595   :  { %v1700_v59 = vrot.slane %v1699_v58, 2 }
 0x597   :  { %v1701_v60 = vadd.f32 %v1700_v59, %v1699_v58  ;;  %2691 = vset.pattern.permute.xlu1 %v2726_v8 }
 0x599   :  { %v1702_v61 = vrot.slane %v1701_v60, 1 }
 0x59b   :  { %v1703_v62 = vadd.f32 %v1702_v61, %v1701_v60 }
 0x59d   :  { %2654 = vpush %v1703_v62 }
 0x5ce   :  { %s2655_s21 = spop %2654 }
 0x5cf   :  { %v1705_v4 = vstv %s2655_s21 }
 0x5d0   :  { %2719 = vrcp.f32 %v1705_v4 }
 0x5da   :  { %v2720_v1 = vpop.eup %2719 }
 0x5db   :  { %v3202_v5 = vmul.f32 %v2720_v1, %v3126_v2  ;;  %v3205_v6 = vmul.f32 %v2720_v1, %v3124_v63  ;;  %v3210_v12 = vmul.f32 %v2720_v1, %v3135_v18  ;;  %v3213_v8 = vmul.f32 %v2720_v1, %v3131_v13 }
 0x5dc   :  { %v3218_v2 = vmul.f32 %v2720_v1, %v3141_v24  ;;  %v3221_v63 = vmul.f32 %v2720_v1, %v3137_v20  ;;  %v3226_v0 = vmul.f32 %v2720_v1, %v3145_v29  ;;  %v3234_v14 = vmul.f32 %v2720_v1, %v3151_v35 }
 0x5dd   :  { %1722 = vperm.xlu0 %2692, %v3202_v5   ;;  %1717 = vperm.xlu1 %2691, %v3205_v6  }
 0x5e1   :  { %1737 = vperm.xlu0 %2692, %v3210_v12   ;;  %1727 = vperm.xlu1 %2691, %v3213_v8  }
 0x5e5   :  { %1747 = vperm.xlu0 %2692, %v3218_v2   ;;  %1732 = vperm.xlu1 %2691, %v3221_v63  }
 0x5e9   :  { %2693 = vset.pattern.permute.xlu0 %v2725_v7  ;;  %1742 = vperm.xlu1 %2691, %v3226_v0   ;;  %v3230_v13 = vpop.permute.xlu1 %1605  ;;  %v3249_v20 = vpop.permute.xlu0 %1625 }
 0x5ea   :  { %1764 = vperm.xlu0 %2693, %v3205_v6  }
 0x5ed   :  { %1752 = vperm.xlu1 %2691, %v3234_v14   ;;  %v3237_v17 = vpop.permute.xlu1 %1610 }
 0x5ee   :  { %1776 = vperm.xlu0 %2693, %v3221_v63   ;;  %v1653_v22 = vpop.permute.xlu0 %1652 }
 0x5ef   :  { %v1683_v33 = vmul.f32 %v1653_v22, %v3161_v49 }
 0x5f1   :  { %2694 = vset.pattern.permute.xlu1 %v2725_v7  ;;  %v3241_v18 = vpop.permute.xlu1 %1615 }
 0x5f2   :  { %1784 = vperm.xlu0 %2693, %v3226_v0   ;;  %1768 = vperm.xlu1 %2694, %v3202_v5   ;;  %v1665_v24 = vpop.permute.xlu0 %1664 }
 0x5f3   :  { %v1686_v28 = vmul.f32 %v1665_v24, %v3175_v52 }
 0x5f5   :  { %v3245_v19 = vpop.permute.xlu1 %1620  ;;  %v2190_v35 = vrot.slane %v1686_v28, 5 }
 0x5f6   :  { %1792 = vperm.xlu0 %2693, %v3234_v14   ;;  %1772 = vperm.xlu1 %2694, %v3213_v8   ;;  %v1673_v31 = vpop.permute.xlu0 %1672 }
 0x5f7   :  { %v1688_v36 = vmul.f32 %v1673_v31, %v3180_v53 }
 0x5f9   :  { %v3251_v21 = vpop.permute.xlu1 %1630  ;;  %v2194_v16 = vrot.slane %v1688_v36, 3 }
 0x5fa   :  { %2695 = vset.pattern.permute.xlu0 %v2727_v9  ;;  %1780 = vperm.xlu1 %2694, %v3210_v12  }
 0x5fb   :  { %1968 = vperm.xlu0 %2695, %v3202_v5  }
 0x5fd   :  { %v3256_v7 = vpop.permute.xlu1 %1635 }
 0x5fe   :  { %1788 = vperm.xlu1 %2694, %v3218_v2  }
 0x5ff   :  { %2698 = vset.pattern.permute.xlu0 %v2728_v10 }
 0x600   :  { %1852 = vperm.xlu0 %2698, %v3213_v8  }
 0x601   :  { %v3261_v23 = vpop.permute.xlu1 %1640 }
 0x602   :  { %2696 = vset.pattern.permute.xlu1 %v2728_v10 }
 0x603   :  { %1848 = vperm.xlu1 %2696, %v3202_v5  }
 0x604   :  { %2699 = vset.pattern.permute.xlu0 %v2729_v11 }
 0x605   :  { %2048 = vperm.xlu0 %2699, %v3202_v5  }
 0x606   :  { %v1657_v26 = vpop.permute.xlu1 %1656 }
 0x607   :  { %v1684_v27 = vmul.f32 %v1657_v26, %v3166_v50  ;;  %2697 = vset.pattern.permute.xlu1 %v2727_v9 }
 0x608   :  { %1972 = vperm.xlu1 %2697, %v3213_v8  }
 0x609   :  { %2701 = vset.pattern.permute.xlu0 %v2727_v9  ;;  %v2186_v29 = vrot.slane %v1684_v27, 7 }
 0x60a   :  { %1980 = vperm.xlu0 %2701, %v3210_v12   ;;  %v1661_v30 = vpop.permute.xlu1 %1660 }
 0x60b   :  { %v1685_v32 = vmul.f32 %v1661_v30, %v3172_v51  ;;  %v2187_v37 = vsel %vm1561_vm13, %v2186_v29, %v1683_v33 }
 0x60c   :  { %1964 = vperm.xlu1 %2697, %v3205_v6  }
 0x60d   :  { %v2188_v34 = vrot.slane %v1685_v32, 6 }
 0x60e   :  { %1984 = vperm.xlu0 %2701, %v3226_v0   ;;  %v1669_v25 = vpop.permute.xlu1 %1668 }
 0x60f   :  { %v2189_v38 = vsel %vm1564_vm14, %v2188_v34, %v2187_v37  ;;  %v1687_v39 = vmul.f32 %v1669_v25, %v3158_v48 }
 0x610   :  { %v2191_v40 = vsel %vm1567_vm15, %v2190_v35, %v2189_v38  ;;  %1976 = vperm.xlu1 %2697, %v3221_v63  }
 0x611   :  { %v2192_v41 = vrot.slane %v1687_v39, 4 }
 0x612   :  { %2705 = vset.pattern.permute.xlu0 %v2729_v11  ;;  %v3327_v43 = vpop.permute.xlu1 %1676 }
 0x613   :  { %v2193_v15 = vsel %vm1570_vm1, %v2192_v41, %v2191_v40  ;;  %2056 = vperm.xlu0 %2705, %v3221_v63  }
 0x614   :  { %2700 = vset.pattern.permute.xlu1 %v2728_v10  ;;  %v3288_v42 = vsel %vm1573_vm3, %v2194_v16, %v2193_v15 }
 0x615   :  { %1844 = vperm.xlu1 %2700, %v3205_v6  }
 0x617   :  { %2060 = vperm.xlu0 %2705, %v3210_v12  }
 0x619   :  { %1856 = vperm.xlu1 %2700, %v3221_v63  }
 0x61b   :  { %2709 = vset.pattern.permute.xlu0 %v2727_v9 }
 0x61c   :  { %1992 = vperm.xlu0 %2709, %v3234_v14  }
 0x61d   :  { %2702 = vset.pattern.permute.xlu1 %v2729_v11 }
 0x61e   :  { %2052 = vperm.xlu1 %2702, %v3213_v8  }
 0x620   :  { %2712 = vset.pattern.permute.xlu0 %v2729_v11 }
 0x621   :  { %2068 = vperm.xlu0 %2712, %v3218_v2  }
 0x622   :  { %2703 = vset.pattern.permute.xlu1 %v2728_v10 }
 0x623   :  { %1860 = vperm.xlu1 %2703, %v3210_v12  }
 0x625   :  { %2715 = vset.pattern.permute.xlu0 %v2723_v3 }
 0x626   :  { %1932 = vperm.xlu0 %2715, %v3213_v8  }
 0x627   :  { %2704 = vset.pattern.permute.xlu1 %v2729_v11 }
 0x628   :  { %2044 = vperm.xlu1 %2704, %v3205_v6  }
 0x62a   :  { %1940 = vperm.xlu0 %2715, %v3210_v12  }
 0x62c   :  { %2706 = vset.pattern.permute.xlu1 %v2728_v10 }
 0x62d   :  { %1864 = vperm.xlu1 %2706, %v3226_v0  }
 0x62e   :  { %1948 = vperm.xlu0 %2715, %v3218_v2  }
 0x631   :  { %2707 = vset.pattern.permute.xlu1 %v2727_v9  ;;  %v3325_v9 = vpop.permute.xlu0 %1680 }
 0x632   :  { %1988 = vperm.xlu1 %2707, %v3218_v2   ;;  %2716 = vset.pattern.permute.xlu0 %v2729_v11 }
 0x636   :  { %2708 = vset.pattern.permute.xlu1 %v2728_v10 }
 0x637   :  { %1868 = vperm.xlu1 %2708, %v3218_v2  }
 0x63b   :  { %2710 = vset.pattern.permute.xlu1 %v2729_v11 }
 0x63c   :  { %2064 = vperm.xlu1 %2710, %v3226_v0  }
 0x640   :  { %2711 = vset.pattern.permute.xlu1 %v2728_v10 }
 0x641   :  { %1872 = vperm.xlu1 %2711, %v3234_v14  }
 0x645   :  { %2713 = vset.pattern.permute.xlu1 %v2729_v11 }
 0x646   :  { %2072 = vperm.xlu1 %2713, %v3234_v14  }
 0x64a   :  { %2714 = vset.pattern.permute.xlu1 %v2723_v3 }
 0x64b   :  { %1928 = vperm.xlu1 %2714, %v3202_v5  }
 0x64f   :  { %1924 = vperm.xlu1 %2714, %v3205_v6  }
 0x653   :  { %1936 = vperm.xlu1 %2714, %v3221_v63  }
 0x657   :  { %1944 = vperm.xlu1 %2714, %v3226_v0  }
 0x65b   :  { %1952 = vperm.xlu1 %2714, %v3234_v14  }
 0x65c   :  { %v3330_v10 = vpop.permute.xlu0 %1722  ;;  %v3332_v11 = vpop.permute.xlu1 %1717 }
 0x660   :  { %v3334_v44 = vpop.permute.xlu0 %1737  ;;  %v3336_v3 = vpop.permute.xlu1 %1727 }
 0x664   :  { %v3338_v45 = vpop.permute.xlu0 %1747  ;;  %v3340_v46 = vpop.permute.xlu1 %1732 }
 0x668   :  { %v3342_v47 = vpop.permute.xlu1 %1742 }
 0x669   :  { %v1765_v56 = vpop.permute.xlu0 %1764 }
 0x66a   :  { %v1795_v57 = vmul.f32 %v1765_v56, %v3205_v6 }
 0x66c   :  { %1811 = vrot.lane.b32.xlu1 %v1795_v57, %s2741_s4  ;;  %v3346_v58 = vpop.permute.xlu1 %1752 }
 0x66d   :  { %v1777_v59 = vpop.permute.xlu0 %1776 }
 0x66e   :  { %v1798_v26 = vmul.f32 %v1777_v59, %v3221_v63 }
 0x671   :  { %v1785_v60 = vpop.permute.xlu0 %1784  ;;  %v1769_v61 = vpop.permute.xlu1 %1768 }
 0x672   :  { %v1796_v62 = vmul.f32 %v1769_v61, %v3202_v5  ;;  %v1800_v16 = vmul.f32 %v1785_v60, %v3226_v0 }
 0x674   :  { %1813 = vrot.lane.b32.xlu0 %v1796_v62, %s2741_s4 }
 0x675   :  { %v1793_v4 = vpop.permute.xlu0 %1792  ;;  %v1773_v1 = vpop.permute.xlu1 %1772 }
 0x676   :  { %v1797_v22 = vmul.f32 %v1773_v1, %v3213_v8 }
 0x678   :  { %1815 = vrot.lane.b32.xlu1 %v1797_v22, %s2741_s4 }
 0x679   :  { %v1781_v24 = vpop.permute.xlu1 %1780 }
 0x67a   :  { %v1969_v27 = vpop.permute.xlu0 %1968  ;;  %v1799_v32 = vmul.f32 %v1781_v24, %v3210_v12 }
 0x67b   :  { %v1996_v28 = vmul.f32 %v1969_v27, %v3202_v5 }
 0x67c   :  { %1817 = vrot.lane.b32.xlu1 %v1798_v26, %s2741_s4 }
 0x67d   :  { %2013 = vrot.lane.b32.xlu0 %v1996_v28, %s2741_s4  ;;  %v1789_v29 = vpop.permute.xlu1 %1788 }
 0x67e   :  { %v1801_v60 = vmul.f32 %v1789_v29, %v3218_v2 }
 0x67f   :  { %v1853_v33 = vpop.permute.xlu0 %1852 }
 0x680   :  { %v1877_v37 = vmul.f32 %v1853_v33, %v3213_v8  ;;  %v1802_v33 = vmul.f32 %v1793_v4, %v3234_v14  ;;  %v1644_v4 = vmul.f32 %v3237_v17, %v3166_v50  ;;  %v1643_v17 = vmul.f32 %v3230_v13, %v3161_v49 }
 0x682   :  { %v1849_v30 = vpop.permute.xlu1 %1848 }
 0x683   :  { %v1876_v31 = vmul.f32 %v1849_v30, %v3202_v5 }
 0x684   :  { %v2049_v38 = vpop.permute.xlu0 %2048 }
 0x685   :  { %1893 = vrot.lane.b32.xlu0 %v1876_v31, %s2742_s0  ;;  %v2076_v40 = vmul.f32 %v2049_v38, %v3202_v5 }
 0x687   :  { %v1973_v34 = vpop.permute.xlu1 %1972 }
 0x688   :  { %v1997_v35 = vmul.f32 %v1973_v34, %v3213_v8 }
 0x689   :  { %1819 = vrot.lane.b32.xlu0 %v1799_v32, %s2741_s4  ;;  %v1981_v57 = vpop.permute.xlu0 %1980 }
 0x68a   :  { %2015 = vrot.lane.b32.xlu1 %v1997_v35, %s2741_s4  ;;  %v1999_v61 = vmul.f32 %v1981_v57, %v3210_v12  ;;  %v2161_v57 = vrot.slane %v1644_v4, 7 }
 0x68b   :  { %v1965_v36 = vpop.permute.xlu1 %1964 }
 0x68c   :  { %v1995_v25 = vmul.f32 %v1965_v36, %v3205_v6 }
 0x68d   :  { %v1985_v1 = vpop.permute.xlu0 %1984 }
 0x68e   :  { %1895 = vrot.lane.b32.xlu1 %v1877_v37, %s2742_s0  ;;  %2011 = vrot.lane.b32.xlu0 %v1995_v25, %s2741_s4  ;;  %v2000_v26 = vmul.f32 %v1985_v1, %v3226_v0  ;;  %v1647_v1 = vmul.f32 %v3249_v20, %v3158_v48 }
 0x68f   :  { %v1977_v39 = vpop.permute.xlu1 %1976 }
 0x690   :  { %v1998_v41 = vmul.f32 %v1977_v39, %v3221_v63 }
 0x692   :  { %2093 = vrot.lane.b32.xlu0 %v2076_v40, %s2742_s0  ;;  %2017 = vrot.lane.b32.xlu1 %v1998_v41, %s2741_s4  ;;  %v2057_v27 = vpop.permute.xlu0 %2056  ;;  %v1645_v41 = vmul.f32 %v3241_v18, %v3172_v51 }
 0x693   :  { %v2078_v31 = vmul.f32 %v2057_v27, %v3221_v63 }
 0x694   :  { %v1845_v15 = vpop.permute.xlu1 %1844 }
 0x695   :  { %v1875_v56 = vmul.f32 %v1845_v15, %v3205_v6  ;;  %v1646_v15 = vmul.f32 %v3245_v19, %v3175_v52  ;;  %v1649_v19 = vmul.f32 %v3256_v7, %v3190_v55  ;;  %v1689_v7 = vmul.f32 %v3327_v43, %v3190_v55 }
 0x696   :  { %1821 = vrot.lane.b32.xlu1 %v1800_v16, %s2741_s4  ;;  %v2061_v34 = vpop.permute.xlu0 %2060  ;;  %v1690_v43 = vmul.f32 %v3325_v9, %v3185_v54 }
 0x697   :  { %1891 = vrot.lane.b32.xlu0 %v1875_v56, %s2742_s0  ;;  %v2079_v37 = vmul.f32 %v2061_v34, %v3210_v12  ;;  %v2171_v20 = vrot.slane %v1649_v19, 2  ;;  %v2196_v34 = vrot.slane %v1689_v7, 2  ;;  %v1755_v7 = vmul.f32 %v3332_v11, %v3205_v6 }
 0x698   :  { %v1857_v59 = vpop.permute.xlu1 %1856 }
 0x699   :  { %v1878_v62 = vmul.f32 %v1857_v59, %v3221_v63  ;;  %v2163_v59 = vrot.slane %v1645_v41, 6 }
 0x69b   :  { %2019 = vrot.lane.b32.xlu0 %v1999_v61, %s2741_s4  ;;  %1897 = vrot.lane.b32.xlu1 %v1878_v62, %s2742_s0  ;;  %v1993_v38 = vpop.permute.xlu0 %1992  ;;  %v2165_v61 = vrot.slane %v1646_v15, 5  ;;  %v1648_v62 = vmul.f32 %v3251_v21, %v3180_v53 }
 0x69c   :  { %v2002_v40 = vmul.f32 %v1993_v38, %v3234_v14  ;;  %v2197_v38 = vsel %vm1576_vm4, %v2196_v34, %v3288_v42 }
 0x69d   :  { %v2053_v22 = vpop.permute.xlu1 %2052  ;;  %v2169_v27 = vrot.slane %v1648_v62, 3 }
 0x69e   :  { %v2077_v24 = vmul.f32 %v2053_v22, %v3213_v8  ;;  %v2162_v22 = vsel %vm1561_vm13, %v2161_v57, %v1643_v17 }
 0x69f   :  { %1823 = vrot.lane.b32.xlu0 %v1801_v60, %s2741_s4  ;;  %v2164_v13 = vsel %vm1564_vm14, %v2163_v59, %v2162_v22 }
 0x6a0   :  { %2095 = vrot.lane.b32.xlu1 %v2077_v24, %s2742_s0  ;;  %v1650_v24 = vmul.f32 %v3261_v23, %v3185_v54  ;;  %v2166_v21 = vsel %vm1567_vm15, %v2165_v61, %v2164_v13  ;;  %v1757_v13 = vmul.f32 %v3336_v3, %v3213_v8 }
 0x6a2   :  { %v1861_v28 = vpop.permute.xlu1 %1860 }
 0x6a3   :  { %v1879_v30 = vmul.f32 %v1861_v28, %v3210_v12  ;;  %2021 = vrot.lane.b32.xlu0 %v2000_v26, %s2741_s4  ;;  %v2069_v26 = vpop.permute.xlu0 %2068  ;;  %v2167_v28 = vrot.slane %v1647_v1, 4 }
 0x6a5   :  { %1899 = vrot.lane.b32.xlu1 %v1879_v30, %s2742_s0  ;;  %v2081_v30 = vmul.f32 %v2069_v26, %v3218_v2  ;;  %v2168_v23 = vsel %vm1570_vm1, %v2167_v28, %v2166_v21  ;;  %v1756_v26 = vmul.f32 %v3330_v10, %v3202_v5 }
 0x6a7   :  { %2097 = vrot.lane.b32.xlu0 %v2078_v31, %s2742_s0  ;;  %v2045_v29 = vpop.permute.xlu1 %2044 }
 0x6a8   :  { %v2075_v32 = vmul.f32 %v2045_v29, %v3205_v6  ;;  %v2173_v29 = vrot.slane %v1650_v24, 1 }
 0x6aa   :  { %2091 = vrot.lane.b32.xlu1 %v2075_v32, %s2742_s0 }
 0x6ac   :  { %v1865_v35 = vpop.permute.xlu1 %1864 }
 0x6ad   :  { %v1880_v36 = vmul.f32 %v1865_v35, %v3226_v0 }
 0x6ae   :  { %1825 = vrot.lane.b32.xlu1 %v1802_v33, %s2741_s4  ;;  %v2170_v33 = vsel %vm1573_vm3, %v2169_v27, %v2168_v23 }
 0x6af   :  { %1901 = vrot.lane.b32.xlu0 %v1880_v36, %s2742_s0  ;;  %v2172_v35 = vsel %vm1576_vm4, %v2171_v20, %v2170_v33  ;;  %v1758_v33 = vmul.f32 %v3340_v46, %v3221_v63 }
 0x6b1   :  { %v1989_v25 = vpop.permute.xlu1 %1988 }
 0x6b2   :  { %v2001_v39 = vmul.f32 %v1989_v25, %v3218_v2 }
 0x6b3   :  { %2099 = vrot.lane.b32.xlu0 %v2079_v37, %s2742_s0  ;;  %v2174_v37 = vsel %vm1579_vm5, %v2173_v29, %v2172_v35 }
 0x6b4   :  { %2023 = vrot.lane.b32.xlu1 %v2001_v39, %s2741_s4  ;;  %v2198_v39 = vrot.slane %v1690_v43, 1 }
 0x6b6   :  { %v1869_v16 = vpop.permute.xlu1 %1868  ;;  %v2199_v4 = vsel %vm1579_vm5, %v2198_v39, %v2197_v38 }
 0x6b7   :  { %v1881_v56 = vmul.f32 %v1869_v16, %v3218_v2  ;;  %2025 = vrot.lane.b32.xlu0 %v2002_v40, %s2741_s4  ;;  %v1933_v16 = vpop.permute.xlu0 %1932 }
 0x6b9   :  { %1903 = vrot.lane.b32.xlu1 %v1881_v56, %s2742_s0 }
 0x6bb   :  { %v2065_v18 = vpop.permute.xlu1 %2064  ;;  %v3444_v56 = vpop.permute.xlu0 %1940 }
 0x6bc   :  { %v2080_v60 = vmul.f32 %v2065_v18, %v3226_v0 }
 0x6be   :  { %2101 = vrot.lane.b32.xlu1 %v2080_v60, %s2742_s0 }
 0x6bf   :  { %v3448_v59 = vpop.permute.xlu0 %1948 }
 0x6c0   :  { %v1873_v31 = vpop.permute.xlu1 %1872 }
 0x6c1   :  { %v1882_v32 = vmul.f32 %v1873_v31, %v3234_v14 }
 0x6c2   :  { %2103 = vrot.lane.b32.xlu1 %v2081_v30, %s2742_s0 }
 0x6c3   :  { %1905 = vrot.lane.b32.xlu0 %v1882_v32, %s2742_s0 }
 0x6c5   :  { %v2073_v36 = vpop.permute.xlu1 %2072 }
 0x6c6   :  { %v2082_v25 = vmul.f32 %v2073_v36, %v3234_v14  ;;  %2175 = vrot.lane.b32.xlu1 %v2174_v37, %s2732_s11  ;;  %s2744_s11 = smov 12  }
 0x6c8   :  { %2105 = vrot.lane.b32.xlu0 %v2082_v25, %s2742_s0 }
 0x6ca   :  { %v1929_v40 = vpop.permute.xlu1 %1928 }
 0x6cb   :  { %v1956_v46 = vmul.f32 %v1929_v40, %v3202_v5 }
 0x6cc   :  { %2200 = vrot.lane.b32.xlu0 %v2199_v4, %s2743_s1 }
 0x6ce   :  { %v1925_v9 = vpop.permute.xlu1 %1924 }
 0x6d2   :  { %v1937_v41 = vpop.permute.xlu1 %1936 }
 0x6d6   :  { %v3442_v15 = vpop.permute.xlu1 %1944 }
 0x6da   :  { %v3446_v57 = vpop.permute.xlu1 %1952 }
 0x6de   :  { %v1812_v17 = vpop.permute.xlu1 %1811 }
 0x6df   :  { %v1835_v29 = vadd.f32 %v1812_v17, %v1755_v7  ;;  %v1955_v7 = vmul.f32 %v1925_v9, %v3205_v6 }
 0x6e6   :  { %v1814_v42 = vpop.permute.xlu0 %1813 }
 0x6e7   :  { %v1836_v21 = vadd.f32 %v1814_v42, %v1756_v26  ;;  %v1759_v42 = vmul.f32 %v3334_v44, %v3210_v12 }
 0x6ea   :  { %v1816_v61 = vpop.permute.xlu1 %1815 }
 0x6eb   :  { %v1837_v20 = vadd.f32 %v1816_v61, %v1757_v13 }
 0x6ee   :  { %v1818_v1 = vpop.permute.xlu1 %1817 }
 0x6ef   :  { %v2014_v62 = vpop.permute.xlu0 %2013  ;;  %v1838_v43 = vadd.f32 %v1818_v1, %v1758_v33 }
 0x6f0   :  { %v2036_v26 = vadd.f32 %v2014_v62, %v1956_v46 }
 0x6f7   :  { %v1894_v18 = vpop.permute.xlu0 %1893 }
 0x6f8   :  { %v1916_v30 = vadd.f32 %v1894_v18, %v1836_v21  ;;  %v1957_v18 = vmul.f32 %v1933_v16, %v3213_v8 }
 0x6fa   :  { %v2211_v34 = vrot.slane %v1916_v30, 7 }
 0x6fb   :  { %v1820_v19 = vpop.permute.xlu0 %1819 }
 0x6fc   :  { %v2016_v60 = vpop.permute.xlu1 %2015  ;;  %v1839_v1 = vadd.f32 %v1820_v19, %v1759_v42 }
 0x6fd   :  { %v2037_v21 = vadd.f32 %v2016_v60, %v1957_v18 }
 0x700   :  { %v2012_v22 = vpop.permute.xlu0 %2011  ;;  %v1896_v24 = vpop.permute.xlu1 %1895 }
 0x701   :  { %v1917_v31 = vadd.f32 %v1896_v24, %v1837_v20  ;;  %v1958_v24 = vmul.f32 %v1937_v41, %v3221_v63  ;;  %v2035_v44 = vadd.f32 %v2012_v22, %v1955_v7  ;;  %v1760_v41 = vmul.f32 %v3342_v47, %v3226_v0 }
 0x703   :  { %v2213_v35 = vrot.slane %v1917_v31, 6 }
 0x704   :  { %v2094_v27 = vpop.permute.xlu0 %2093  ;;  %v2018_v28 = vpop.permute.xlu1 %2017 }
 0x705   :  { %v2116_v30 = vadd.f32 %v2094_v27, %v2036_v26  ;;  %v2038_v31 = vadd.f32 %v2018_v28, %v1958_v24  ;;  %v1960_v24 = vmul.f32 %v3442_v15, %v3226_v0  ;;  %v1962_v15 = vmul.f32 %v3446_v57, %v3234_v14 }
 0x707   :  { %v2236_v16 = vrot.slane %v2116_v30, 7 }
 0x708   :  { %v1822_v32 = vpop.permute.xlu1 %1821 }
 0x709   :  { %v1892_v23 = vpop.permute.xlu0 %1891  ;;  %v1840_v9 = vadd.f32 %v1822_v32, %v1760_v41  ;;  %v1959_v32 = vmul.f32 %v3444_v56, %v3210_v12 }
 0x70a   :  { %v1915_v10 = vadd.f32 %v1892_v23, %v1835_v29 }
 0x70c   :  { %v2212_v3 = vsel %vm1561_vm13, %v2211_v34, %v1915_v10 }
 0x70d   :  { %v2214_v36 = vsel %vm1564_vm14, %v2213_v35, %v2212_v3  ;;  %v2020_v37 = vpop.permute.xlu0 %2019  ;;  %v1898_v25 = vpop.permute.xlu1 %1897 }
 0x70e   :  { %v1918_v38 = vadd.f32 %v1898_v25, %v1838_v43 }
 0x710   :  { %v2215_v11 = vrot.slane %v1918_v38, 5 }
 0x711   :  { %v1824_v39 = vpop.permute.xlu0 %1823 }
 0x712   :  { %v2216_v4 = vsel %vm1567_vm15, %v2215_v11, %v2214_v36  ;;  %v2096_v17 = vpop.permute.xlu1 %2095  ;;  %v1761_v11 = vmul.f32 %v3338_v45, %v3218_v2  ;;  %v1961_v45 = vmul.f32 %v3448_v59, %v3218_v2 }
 0x713   :  { %v2117_v23 = vadd.f32 %v2096_v17, %v2037_v21 }
 0x714   :  { %v1841_v47 = vadd.f32 %v1824_v39, %v1761_v11  ;;  %v2039_v39 = vadd.f32 %v2020_v37, %v1959_v32 }
 0x715   :  { %v2022_v61 = vpop.permute.xlu0 %2021  ;;  %v2238_v62 = vrot.slane %v2117_v23, 6 }
 0x716   :  { %v2040_v21 = vadd.f32 %v2022_v61, %v1960_v24 }
 0x717   :  { %v1900_v13 = vpop.permute.xlu1 %1899 }
 0x718   :  { %v1919_v20 = vadd.f32 %v1900_v13, %v1839_v1  ;;  %v1762_v13 = vmul.f32 %v3346_v58, %v3234_v14 }
 0x719   :  { %v2098_v29 = vpop.permute.xlu0 %2097 }
 0x71a   :  { %v2217_v33 = vrot.slane %v1919_v20, 4  ;;  %v2118_v34 = vadd.f32 %v2098_v29, %v2038_v31 }
 0x71c   :  { %v2218_v40 = vsel %vm1570_vm1, %v2217_v33, %v2216_v4  ;;  %v2092_v10 = vpop.permute.xlu1 %2091  ;;  %v2240_v60 = vrot.slane %v2118_v34, 5 }
 0x71d   :  { %v2115_v19 = vadd.f32 %v2092_v10, %v2035_v44 }
 0x71f   :  { %v2237_v35 = vsel %vm1561_vm13, %v2236_v16, %v2115_v19 }
 0x720   :  { %v2239_v27 = vsel %vm1564_vm14, %v2238_v62, %v2237_v35  ;;  %v1826_v22 = vpop.permute.xlu1 %1825  ;;  %v2123_v35 = vrot.slane %v3166_v50, 7 }
 0x721   :  { %v1902_v28 = vpop.permute.xlu0 %1901  ;;  %v2241_v43 = vsel %vm1567_vm15, %v2240_v60, %v2239_v27  ;;  %v1842_v20 = vadd.f32 %v1826_v22, %v1762_v13  ;;  %v2138_v60 = vrot.slane %v3202_v5, 7  ;;  %v2127_v5 = vrot.slane %v3175_v52, 5 }
 0x722   :  { %v1920_v3 = vadd.f32 %v1902_v28, %v1840_v9  ;;  %v2140_v9 = vrot.slane %v3213_v8, 6  ;;  %v2125_v28 = vrot.slane %v3172_v51, 6  ;;  %v2144_v8 = vrot.slane %v3210_v12, 4 }
 0x723   :  { %v2139_v27 = vsel %vm1561_vm13, %v2138_v60, %v3205_v6  ;;  %v2129_v6 = vrot.slane %v3158_v48, 4  ;;  %v2148_v52 = vrot.slane %v3218_v2, 2  ;;  %v2133_v12 = vrot.slane %v3190_v55, 2 }
 0x724   :  { %v2219_v36 = vrot.slane %v1920_v3, 3  ;;  %v2141_v22 = vsel %vm1564_vm14, %v2140_v9, %v2139_v27  ;;  %v2142_v3 = vrot.slane %v3221_v63, 5  ;;  %v2131_v63 = vrot.slane %v3180_v53, 3 }
 0x725   :  { %v2100_v4 = vpop.permute.xlu0 %2099  ;;  %v2150_v48 = vrot.slane %v3234_v14, 1 }
 0x726   :  { %v2220_v25 = vsel %vm1573_vm3, %v2219_v36, %v2218_v40  ;;  %v2024_v38 = vpop.permute.xlu1 %2023  ;;  %v2119_v7 = vadd.f32 %v2100_v4, %v2039_v39  ;;  %v2143_v50 = vsel %vm1567_vm15, %v2142_v3, %v2141_v22 }
 0x727   :  { %v2041_v30 = vadd.f32 %v2024_v38, %v1961_v45  ;;  %v2145_v51 = vsel %vm1570_vm1, %v2144_v8, %v2143_v50 }
 0x728   :  { %v2242_v44 = vrot.slane %v2119_v7, 4 }
 0x729   :  { %v2026_v26 = vpop.permute.xlu0 %2025 }
 0x72a   :  { %v2042_v40 = vadd.f32 %v2026_v26, %v1962_v15  ;;  %v2243_v61 = vsel %vm1570_vm1, %v2242_v44, %v2241_v43  ;;  %v2124_v43 = vsel %vm1561_vm13, %v2123_v35, %v3161_v49  ;;  %v2146_v49 = vrot.slane %v3226_v0, 3 }
 0x72b   :  { %v1904_v17 = vpop.permute.xlu1 %1903  ;;  %v2126_v36 = vsel %vm1564_vm14, %v2125_v28, %v2124_v43  ;;  %v2135_v0 = vrot.slane %v3185_v54, 1 }
 0x72c   :  { %v1921_v42 = vadd.f32 %v1904_v17, %v1841_v47  ;;  %v2147_v11 = vsel %vm1573_vm3, %v2146_v49, %v2145_v51 }
 0x72d   :  { %v2149_v4 = vsel %vm1576_vm4, %v2148_v52, %v2147_v11 }
 0x72e   :  { %v2221_v46 = vrot.slane %v1921_v42, 2 }
 0x730   :  { %v2222_v18 = vsel %vm1576_vm4, %v2221_v46, %v2220_v25  ;;  %v2102_v1 = vpop.permute.xlu1 %2101  ;;  %v2128_v25 = vsel %vm1567_vm15, %v2127_v5, %v2126_v36  ;;  %v2151_v46 = vsel %vm1579_vm5, %v2150_v48, %v2149_v4 }
 0x731   :  { %v2120_v56 = vadd.f32 %v2102_v1, %v2040_v21  ;;  %v2130_v38 = vsel %vm1570_vm1, %v2129_v6, %v2128_v25 }
 0x732   :  { %v2132_v47 = vsel %vm1573_vm3, %v2131_v63, %v2130_v38 }
 0x733   :  { %v2244_v58 = vrot.slane %v2120_v56, 3  ;;  %v2134_v42 = vsel %vm1576_vm4, %v2133_v12, %v2132_v47 }
 0x734   :  { %v2104_v31 = vpop.permute.xlu1 %2103  ;;  %v2136_v53 = vsel %vm1579_vm5, %v2135_v0, %v2134_v42 }
 0x735   :  { %v1906_v29 = vpop.permute.xlu0 %1905  ;;  %v2121_v23 = vadd.f32 %v2104_v31, %v2041_v30  ;;  %v2245_v19 = vsel %vm1573_vm3, %v2244_v58, %v2243_v61  ;;  %v2253_v2 = vsel %vm1582_vm6, %v2136_v53, %v2151_v46 }
 0x736   :  { %v1922_v33 = vadd.f32 %v1906_v29, %v1842_v20 }
 0x737   :  { %v2246_v10 = vrot.slane %v2121_v23, 2 }
 0x738   :  { %v2223_v34 = vrot.slane %v1922_v33, 1  ;;  %v2176_v17 = vpop.permute.xlu1 %2175 }
 0x739   :  { %v2247_v62 = vsel %vm1576_vm4, %v2246_v10, %v2245_v19  ;;  %v2254_v55 = vsel %vm22_vm0, %v2253_v2, %v2176_v17 }
 0x73a   :  { %v2106_v16 = vpop.permute.xlu0 %2105  ;;  %v2224_v59 = vsel %vm1579_vm5, %v2223_v34, %v2222_v18 }
 0x73b   :  { %v2122_v37 = vadd.f32 %v2106_v16, %v2042_v40  ;;  %2225 = vrot.lane.b32.xlu1 %v2224_v59, %s2743_s1 }
 0x73d   :  { %v2248_v41 = vrot.slane %v2122_v37, 1 }
 0x73e   :  { %v2201_v32 = vpop.permute.xlu0 %2200 }
 0x73f   :  { %v2249_v57 = vsel %vm1579_vm5, %v2248_v41, %v2247_v62  ;;  %v2256_v1 = vsel %vm2255_vm8, %v2254_v55, %v2201_v32 }
 0x740   :  { %2250 = vrot.lane.b32.xlu0 %v2249_v57, %s2744_s11 }
 0x7ad   :  { %v2226_v18 = vpop.permute.xlu1 %2225 }
 0x7ae   :  { %v2258_v14 = vsel %vm2257_vm9, %v2256_v1, %v2226_v18 }
 0x7b2   :  { %v2251_v24 = vpop.permute.xlu0 %2250 }
 0x7b3   :  { %v2260_v26 = vsel %vm2259_vm10, %v2258_v14, %v2251_v24 }
 0x7b4   :  { %v2261_v13 = vsel %vm166_vm2, %v2260_v26, 0.0 }
 0x7b5   :  { %2262 = vst [vmem:[%s3534_s5] sm:$0xff] %v2261_v13 }

</bundles_post_ra>
